<compile_context>
chip_gen: v6e
topology: v6e:2x2x1
jax: 0.10.0
libtpu: 0.0.40
codegen_flags: <defaults>
</compile_context>

<pallas_src>
import jax
import jax.numpy as jnp
from jax import lax
from jax.experimental import pallas as pl
from jax.experimental.pallas import tpu as pltpu


def _largest_divisor_leq(n, cap):
    for t in range(min(n, cap), 0, -1):
        if n % t == 0:
            return t
    return 1


def _pick_seq_tile(L, D, d_inner, d_state, n_proj, dt_rank, d_conv):
    """Largest divisor of L whose per-chunk VMEM footprint fits a ~40 MiB budget."""
    budget = 40 * 1024 * 1024
    # bf16 matmul weights (double-buffered by the pipeline)
    weight_bytes = 2 * (D * 2 * d_inner + d_inner * n_proj + dt_rank * d_inner + d_inner * D)
    # small f32 params
    weight_bytes += 4 * (d_conv * d_inner + 4 * d_inner + 2 * D + d_state * d_inner)
    weight_bytes *= 2
    # per sequence-row f32 bytes: xext/xc/z/dt/ys (+ slack) slabs, B/C, in/out blocks
    per_row = 4 * (6 * d_inner + 2 * d_state + 8 * D)
    cap = (budget - weight_bytes) // per_row
    cap = max(8, int(cap))
    cap = min(cap, 512)
    return _largest_divisor_leq(L, cap)


def _silu(x):
    # sigmoid via EUP approx reciprocal: frees VALU slots in the elementwise regions.
    return x * pl.reciprocal(1.0 + jnp.exp(-x), approx=True)


# ----------------------------------------------------------------------------
# Pallas kernel: one (batch, seq-chunk) grid step.
# ----------------------------------------------------------------------------
def _make_block_kernel(TL, D, d_inner, d_state, d_conv, dt_rank, eps, sc, pad):
    tail = d_conv - 1
    bf16 = jnp.bfloat16
    f32 = jnp.float32

    def kernel(hid_ref, res_ref, nw_ref, nb_ref,
               win_ref, cw_ref, cb_ref,
               wx_ref, wdt_ref, dtb_ref,
               negA_ref, dpar_ref, wout_ref,
               out_ref, resout_ref,
               xext_ref, xc_ref, z_ref, dt_ref, bm_ref, cm_ref, ys_ref, state_ref):
        l_idx = pl.program_id(1)

        # ---- per-sequence reset of carried state (scan state + conv halo) ----
        @pl.when(l_idx == 0)
        def _():
            state_ref[...] = jnp.zeros_like(state_ref)
            xext_ref[pl.ds(0, pad), :] = jnp.zeros((pad, d_inner), f32)

        # ---- Add + LayerNorm (fused_add_norm path, residual kept in fp32) ----
        residual = hid_ref[0] + res_ref[0]                     # (TL, D)
        resout_ref[0] = residual
        mu = jnp.mean(residual, axis=-1, keepdims=True)
        var = jnp.mean(jnp.square(residual - mu), axis=-1, keepdims=True)
        hn = (residual - mu) * lax.rsqrt(var + eps)
        hn = hn * nw_ref[...] + nb_ref[...]

        # ---- fused in_proj (one bf16 matmul), split x | z ---------------------
        xz = jnp.dot(hn.astype(bf16), win_ref[...], preferred_element_type=f32)
        x = xz[:, :d_inner]                                    # (TL, d_inner)
        z_ref[...] = xz[:, d_inner:]

        # ---- causal depthwise conv1d + bias + SiLU (halo carried in xext) ----
        xext_ref[pl.ds(pad, TL), :] = x
        cw = cw_ref[...]                                       # (d_conv, d_inner)
        base0 = pad - tail
        xc = cw[0:1, :] * xext_ref[pl.ds(base0, TL), :]
        for k in range(1, d_conv):                             # static unroll
            xc = xc + cw[k:k + 1, :] * xext_ref[pl.ds(base0 + k, TL), :]
        xc = _silu(xc + cb_ref[...])
        xc_ref[...] = xc
        if tail > 0:
            # stash the last (d_conv-1) x rows as the next chunk's conv history
            xext_ref[pl.ds(base0, tail), :] = xext_ref[pl.ds(base0 + TL, tail), :]

        # ---- fused x_proj (dt | B | C) + dt_proj + softplus -------------------
        dbc = jnp.dot(xc.astype(bf16), wx_ref[...], preferred_element_type=f32)
        dt_in = dbc[:, :dt_rank]
        bm_ref[...] = dbc[:, dt_rank:dt_rank + d_state]
        cm_ref[...] = dbc[:, dt_rank + d_state:]
        dt = jnp.dot(dt_in.astype(bf16), wdt_ref[...], preferred_element_type=f32)
        dt = dt + dtb_ref[...]
        # stable softplus; the log argument lies in (1, 2], so plain log is already
        # precise here (log1p only helps when its argument is near 0).
        dt_ref[...] = jnp.maximum(dt, 0.0) + jnp.log(1.0 + jnp.exp(-jnp.abs(dt)))

        # ---- selective scan: sc-step sub-chunks, state persistent in VMEM -----
        A_T = negA_ref[...]                                    # (d_state, d_inner), = -exp(A_log)

        @pl.loop(0, TL // sc)
        def _(s):
            base = pl.multiple_of(s * sc, sc)
            dt_slab = dt_ref[pl.ds(base, sc), :]               # (sc, d_inner)
            u_slab = xc_ref[pl.ds(base, sc), :]                # (sc, d_inner)
            bT = bm_ref[pl.ds(base, sc), :].T                  # (d_state, sc)
            cT = cm_ref[pl.ds(base, sc), :].T                  # (d_state, sc)
            # batch the EUP exp for the whole sub-chunk in one shot
            dA = jnp.exp(dt_slab[:, None, :] * A_T[None, :, :])  # (sc, d_state, d_inner)
            dtu = dt_slab * u_slab                             # (sc, d_inner)
            state = state_ref[...]                             # (d_state, d_inner)
            y_rows = []
            for k in range(sc):                                # static unroll
                state = dA[k] * state + dtu[k:k + 1, :] * bT[:, k:k + 1]
                y_rows.append(jnp.sum(state * cT[:, k:k + 1], axis=0, keepdims=True))
            state_ref[...] = state
            ys_ref[pl.ds(base, sc), :] = jnp.concatenate(y_rows, axis=0)

        # ---- D skip, SiLU(z) gate, out_proj -----------------------------------
        z = z_ref[...]
        y = ys_ref[...] + xc_ref[...] * dpar_ref[...]
        y = y * _silu(z)
        out_ref[0] = jnp.dot(y.astype(bf16), wout_ref[...], preferred_element_type=f32)

    return kernel


# ----------------------------------------------------------------------------
# Wrapper
# ----------------------------------------------------------------------------
@jax.jit
def block_forward(hidden, residual, params):
    eps = 1e-5
    B, L, D = hidden.shape
    d_conv, d_inner = params["conv_w"].shape
    d_state = params["a_log_t"].shape[0]
    dt_rank = params["w_dt"].shape[0]
    n_proj = dt_rank + 2 * d_state

    TL = _pick_seq_tile(L, D, d_inner, d_state, n_proj, dt_rank, d_conv)
    SC = _largest_divisor_leq(TL, 8)      # scan sub-chunk / unroll factor
    PAD = 8                               # conv-halo slot, keeps the chunk store aligned
    assert d_conv - 1 <= PAD
    n_l = L // TL

    kernel = _make_block_kernel(TL, D, d_inner, d_state, d_conv, dt_rank, eps, SC, PAD)

    def _full(shape):
        nd = len(shape)
        return pl.BlockSpec(shape, lambda b, l, _nd=nd: (0,) * _nd)

    seq_block = pl.BlockSpec((1, TL, D), lambda b, l: (b, l, 0))

    in_specs = [
        seq_block,                          # hidden
        seq_block,                          # residual
        _full((1, D)),                      # norm weight
        _full((1, D)),                      # norm bias
        _full((D, 2 * d_inner)),            # in_proj (x | z), bf16
        _full((d_conv, d_inner)),           # conv1d weight
        _full((1, d_inner)),                # conv1d bias
        _full((d_inner, n_proj)),           # x_proj (dt | B | C), bf16
        _full((dt_rank, d_inner)),          # dt_proj weight, bf16
        _full((1, d_inner)),                # dt_proj bias
        _full((d_state, d_inner)),          # -exp(A_log) (transposed), precomputed
        _full((1, d_inner)),                # D
        _full((d_inner, D)),                # out_proj, bf16
    ]
    out_specs = [seq_block, seq_block]
    out_shape = (
        jax.ShapeDtypeStruct((B, L, D), jnp.float32),   # mixer output
        jax.ShapeDtypeStruct((B, L, D), jnp.float32),   # residual
    )
    scratch_shapes = [
        pltpu.VMEM((TL + PAD, d_inner), jnp.float32),   # x chunk + conv halo
        pltpu.VMEM((TL, d_inner), jnp.float32),         # xc (post conv + SiLU)
        pltpu.VMEM((TL, d_inner), jnp.float32),         # z (gate branch)
        pltpu.VMEM((TL, d_inner), jnp.float32),         # dt (post softplus)
        pltpu.VMEM((TL, d_state), jnp.float32),         # B
        pltpu.VMEM((TL, d_state), jnp.float32),         # C
        pltpu.VMEM((TL, d_inner), jnp.float32),         # scan output ys
        pltpu.VMEM((d_state, d_inner), jnp.float32),    # carried scan state
    ]

    grid_spec = pltpu.PrefetchScalarGridSpec(
        num_scalar_prefetch=0,
        grid=(B, n_l),
        in_specs=in_specs,
        out_specs=out_specs,
        scratch_shapes=scratch_shapes,
    )

    fn = pl.pallas_call(
        kernel,
        grid_spec=grid_spec,
        out_shape=out_shape,
        compiler_params=pltpu.CompilerParams(
            dimension_semantics=("parallel", "arbitrary"),
            vmem_limit_bytes=64 * 1024 * 1024,
        ),
    )

    bf16 = jnp.bfloat16
    neg_a = -jnp.exp(params["a_log_t"])     # hoisted: computed once per call, not per chunk
    out, res = fn(
        hidden.astype(jnp.float32), residual.astype(jnp.float32),
        params["norm_w"], params["norm_b"],
        params["w_in"].astype(bf16),
        params["conv_w"], params["conv_b"],
        params["w_x"].astype(bf16),
        params["w_dt"].astype(bf16),
        params["dt_bias"],
        neg_a, params["D"],
        params["w_out"].astype(bf16),
    )
    return out, res


# ----------------------------------------------------------------------------
# Pure-JAX reference (same math / same bf16 matmul boundaries) for checking.
# ----------------------------------------------------------------------------
def block_reference(hidden, residual, p):
    bf = jnp.bfloat16
    f32 = jnp.float32

    resid = hidden + residual
    mu = resid.mean(-1, keepdims=True)
    var = ((resid - mu) ** 2).mean(-1, keepdims=True)
    hn = (resid - mu) / jnp.sqrt(var + 1e-5) * p["norm_w"][0] + p["norm_b"][0]

    d_conv, d_inner = p["conv_w"].shape
    d_state = p["a_log_t"].shape[0]
    dt_rank = p["w_dt"].shape[0]

    xz = jnp.einsum("bld,de->ble", hn.astype(bf), p["w_in"].astype(bf),
                    preferred_element_type=f32)
    x, z = xz[..., :d_inner], xz[..., d_inner:]

    B_, L, _ = x.shape
    xpad = jnp.pad(x, ((0, 0), (d_conv - 1, 0), (0, 0)))
    xc = sum(p["conv_w"][k] * xpad[:, k:k + L, :] for k in range(d_conv)) + p["conv_b"][0]
    xc = xc * jax.nn.sigmoid(xc)

    dbc = jnp.einsum("ble,ef->blf", xc.astype(bf), p["w_x"].astype(bf),
                     preferred_element_type=f32)
    dt_in = dbc[..., :dt_rank]
    Bm = dbc[..., dt_rank:dt_rank + d_state]
    Cm = dbc[..., dt_rank + d_state:]
    dt = jnp.einsum("blr,re->ble", dt_in.astype(bf), p["w_dt"].astype(bf),
                    preferred_element_type=f32) + p["dt_bias"][0]
    dt = jax.nn.softplus(dt)

    A = -jnp.exp(p["a_log_t"].T)                    # (d_inner, d_state)
    state = jnp.zeros((B_, d_inner, d_state), f32)
    ys = []
    for i in range(L):
        dA = jnp.exp(dt[:, i, :, None] * A[None])
        dBu = (dt[:, i] * xc[:, i])[:, :, None] * Bm[:, i][:, None, :]
        state = dA * state + dBu
        ys.append(jnp.einsum("bdn,bn->bd", state, Cm[:, i]))
    y = jnp.stack(ys, axis=1)
    y = y + xc * p["D"][0]
    y = y * (z * jax.nn.sigmoid(z))
    out = jnp.einsum("ble,ed->bld", y.astype(bf), p["w_out"].astype(bf),
                     preferred_element_type=f32)
    return out, resid


# ----------------------------------------------------------------------------
# Deterministic parameter init (shapes follow Mamba(d_model) + LayerNorm(d_model)).
# ----------------------------------------------------------------------------
def init_params(key, d_model, d_inner, d_state, d_conv, dt_rank):
    ks = jax.random.split(key, 9)
    s = 0.1
    norm_w = 1.0 + s * jax.random.normal(ks[0], (d_model,), jnp.float32)
    norm_b = s * jax.random.normal(ks[1], (d_model,), jnp.float32)
    w_in = s * jax.random.normal(ks[2], (2 * d_inner, d_model), jnp.float32)   # (out, in)
    conv_w = s * jax.random.normal(ks[3], (d_inner, d_conv), jnp.float32)      # depthwise
    conv_b = s * jax.random.normal(ks[4], (d_inner,), jnp.float32)
    w_xproj = s * jax.random.normal(ks[5], (dt_rank + 2 * d_state, d_inner), jnp.float32)
    w_dt = s * jax.random.normal(ks[6], (d_inner, dt_rank), jnp.float32)
    dt_bias = s * jax.random.normal(ks[7], (d_inner,), jnp.float32)
    a_log = jnp.log(jnp.broadcast_to(
        jnp.arange(1, d_state + 1, dtype=jnp.float32), (d_inner, d_state)))
    d_param = jnp.ones((d_inner,), jnp.float32)
    w_out = s * jax.random.normal(ks[8], (d_model, d_inner), jnp.float32)      # (out, in)

    return {
        "norm_w": norm_w.reshape(1, d_model),
        "norm_b": norm_b.reshape(1, d_model),
        "w_in": w_in.T,                              # (D, 2*d_inner): x half then z half
        "conv_w": conv_w.T,                          # (d_conv, d_inner)
        "conv_b": conv_b.reshape(1, d_inner),
        "w_x": w_xproj.T,                            # (d_inner, dt_rank + 2*d_state)
        "w_dt": w_dt.T,                              # (dt_rank, d_inner)
        "dt_bias": dt_bias.reshape(1, d_inner),
        "a_log_t": a_log.T,                          # (d_state, d_inner)
        "D": d_param.reshape(1, d_inner),
        "w_out": w_out.T,                            # (d_inner, D)
    }


if __name__ == "__main__":
    # Small shapes consistent with the module: batch=2, seq=8, d_model=32
    B, L, D = 2, 8, 32
    expand, d_state, d_conv = 2, 16, 4
    d_inner = expand * D
    dt_rank = -(-D // 16)  # ceil(D/16) == "auto"

    key = jax.random.PRNGKey(0)
    kp, kh, kr = jax.random.split(key, 3)
    params = init_params(kp, D, d_inner, d_state, d_conv, dt_rank)

    hidden = jax.random.normal(kh, (B, L, D), jnp.float32)
    residual = jax.random.normal(kr, (B, L, D), jnp.float32)
    # (For the very first block, residual=None in PyTorch: pass zeros instead.)

    out, res = block_forward(hidden, residual, params)
    jax.block_until_ready((out, res))

    ref_out, ref_res = block_reference(hidden, residual, params)
    assert jnp.allclose(res, ref_res, rtol=1e-5, atol=1e-5), "residual mismatch"
    assert jnp.allclose(out, ref_out, rtol=2e-2, atol=5e-3), "mixer output mismatch"

    # TODO(synk): inference_params / allocate_inference_cache (step-decode conv & ssm
    # state cache path) is not implemented; only the training/prefill forward is covered.
    print("KERNEL_OK")
</pallas_src>

<mosaic_0001>
module attributes {stable_mosaic.version = 11 : i64} {
  func.func @kernel(%arg0: i32, %arg1: i32, %arg2: memref<1x8x32xf32, #tpu.memory_space<vmem>>, %arg3: memref<1x8x32xf32, #tpu.memory_space<vmem>>, %arg4: memref<1x32xf32, #tpu.memory_space<vmem>>, %arg5: memref<1x32xf32, #tpu.memory_space<vmem>>, %arg6: memref<32x128xbf16, #tpu.memory_space<vmem>>, %arg7: memref<4x64xf32, #tpu.memory_space<vmem>>, %arg8: memref<1x64xf32, #tpu.memory_space<vmem>>, %arg9: memref<64x34xbf16, #tpu.memory_space<vmem>>, %arg10: memref<2x64xbf16, #tpu.memory_space<vmem>>, %arg11: memref<1x64xf32, #tpu.memory_space<vmem>>, %arg12: memref<16x64xf32, #tpu.memory_space<vmem>>, %arg13: memref<1x64xf32, #tpu.memory_space<vmem>>, %arg14: memref<64x32xbf16, #tpu.memory_space<vmem>>, %arg15: memref<1x8x32xf32, #tpu.memory_space<vmem>>, %arg16: memref<1x8x32xf32, #tpu.memory_space<vmem>>, %arg17: memref<16x64xf32, #tpu.memory_space<vmem>>, %arg18: memref<8x64xf32, #tpu.memory_space<vmem>>, %arg19: memref<8x64xf32, #tpu.memory_space<vmem>>, %arg20: memref<8x64xf32, #tpu.memory_space<vmem>>, %arg21: memref<8x16xf32, #tpu.memory_space<vmem>>, %arg22: memref<8x16xf32, #tpu.memory_space<vmem>>, %arg23: memref<8x64xf32, #tpu.memory_space<vmem>>, %arg24: memref<16x64xf32, #tpu.memory_space<vmem>>) attributes {dimension_semantics = [#tpu.dimension_semantics<parallel>, #tpu.dimension_semantics<arbitrary>], iteration_bounds = array<i64: 2, 1>, scalar_prefetch = 0 : i64, scratch_operands = 8 : i64, tpu.core_type = #tpu.core_type<tc>, window_params = [{transform_indices = @transform_0, window_bounds = array<i64: 1, 8, 32>}, {transform_indices = @transform_1, window_bounds = array<i64: 1, 8, 32>}, {pipeline_mode = #tpu.pipeline_mode<synchronous>, transform_indices = @transform_2, window_bounds = array<i64: 1, 32>}, {pipeline_mode = #tpu.pipeline_mode<synchronous>, transform_indices = @transform_3, window_bounds = array<i64: 1, 32>}, {pipeline_mode = #tpu.pipeline_mode<synchronous>, transform_indices = @transform_4, window_bounds = array<i64: 32, 128>}, {pipeline_mode = #tpu.pipeline_mode<synchronous>, transform_indices = @transform_5, window_bounds = array<i64: 4, 64>}, {pipeline_mode = #tpu.pipeline_mode<synchronous>, transform_indices = @transform_6, window_bounds = array<i64: 1, 64>}, {pipeline_mode = #tpu.pipeline_mode<synchronous>, transform_indices = @transform_7, window_bounds = array<i64: 64, 34>}, {pipeline_mode = #tpu.pipeline_mode<synchronous>, transform_indices = @transform_8, window_bounds = array<i64: 2, 64>}, {pipeline_mode = #tpu.pipeline_mode<synchronous>, transform_indices = @transform_9, window_bounds = array<i64: 1, 64>}, {pipeline_mode = #tpu.pipeline_mode<synchronous>, transform_indices = @transform_10, window_bounds = array<i64: 16, 64>}, {pipeline_mode = #tpu.pipeline_mode<synchronous>, transform_indices = @transform_11, window_bounds = array<i64: 1, 64>}, {pipeline_mode = #tpu.pipeline_mode<synchronous>, transform_indices = @transform_12, window_bounds = array<i64: 64, 32>}, {transform_indices = @transform_13, window_bounds = array<i64: 1, 8, 32>}, {transform_indices = @transform_14, window_bounds = array<i64: 1, 8, 32>}]} {
    %c0_i32 = arith.constant 0 : i32
    %0 = arith.cmpi eq, %arg1, %c0_i32 : i32
    %1 = arith.extui %0 : i1 to i32
    %c0_i32_0 = arith.constant 0 : i32
    %2 = arith.cmpi ne, %1, %c0_i32_0 : i32
    scf.if %2 {
      %cst_94 = arith.constant 0.000000e+00 : f32
      %260 = vector.broadcast %cst_94 : f32 to vector<16x64xf32>
      %c0_95 = arith.constant 0 : index
      %c0_96 = arith.constant 0 : index
      %261 = vector.load %arg24[%c0_95, %c0_96] : memref<16x64xf32, #tpu.memory_space<vmem>>, vector<16x64xf32>
      tpu.vector_store %arg24[%c0_95, %c0_96], %260 {strides = array<i32>} : memref<16x64xf32, #tpu.memory_space<vmem>>, vector<16x64xf32>,
      %cst_97 = arith.constant 0.000000e+00 : f32
      %262 = vector.broadcast %cst_97 : f32 to vector<8x64xf32>
      %c0_98 = arith.constant 0 : index
      %c0_99 = arith.constant 0 : index
      %263 = vector.load %arg17[%c0_98, %c0_99] : memref<16x64xf32, #tpu.memory_space<vmem>>, vector<8x64xf32>
      tpu.vector_store %arg17[%c0_98, %c0_99], %262 {strides = array<i32>} : memref<16x64xf32, #tpu.memory_space<vmem>>, vector<8x64xf32>,
    } else {
    }
    %c0 = arith.constant 0 : index
    %c0_1 = arith.constant 0 : index
    %c0_2 = arith.constant 0 : index
    %3 = vector.load %arg2[%c0, %c0_1, %c0_2] : memref<1x8x32xf32, #tpu.memory_space<vmem>>, vector<1x8x32xf32>
    %4 = vector.shape_cast %3 : vector<1x8x32xf32> to vector<8x32xf32>
    %c0_3 = arith.constant 0 : index
    %c0_4 = arith.constant 0 : index
    %c0_5 = arith.constant 0 : index
    %5 = vector.load %arg3[%c0_3, %c0_4, %c0_5] : memref<1x8x32xf32, #tpu.memory_space<vmem>>, vector<1x8x32xf32>
    %6 = vector.shape_cast %5 : vector<1x8x32xf32> to vector<8x32xf32>
    %7 = arith.addf %4, %6 : vector<8x32xf32>
    %c0_6 = arith.constant 0 : index
    %c0_7 = arith.constant 0 : index
    %c0_8 = arith.constant 0 : index
    %8 = vector.load %arg16[%c0_6, %c0_7, %c0_8] : memref<1x8x32xf32, #tpu.memory_space<vmem>>, vector<1x8x32xf32>
    %9 = vector.shape_cast %8 : vector<1x8x32xf32> to vector<8x32xf32>
    %10 = vector.shape_cast %7 : vector<8x32xf32> to vector<1x8x32xf32>
    tpu.vector_store %arg16[%c0_6, %c0_7, %c0_8], %10 {strides = array<i32>} : memref<1x8x32xf32, #tpu.memory_space<vmem>>, vector<1x8x32xf32>,
    %cst = arith.constant dense<0.000000e+00> : vector<8xf32>
    %11 = vector.multi_reduction <add>, %7, %cst [1] : vector<8x32xf32> to vector<8xf32>
    %12 = vector.shape_cast %11 : vector<8xf32> to vector<8x1xf32>
    %cst_9 = arith.constant 3.200000e+01 : f32
    %13 = vector.broadcast %cst_9 : f32 to vector<8x1xf32>
    %14 = arith.divf %12, %13 : vector<8x1xf32>
    %15 = vector.broadcast %14 : vector<8x1xf32> to vector<8x32xf32>
    %16 = arith.subf %7, %15 : vector<8x32xf32>
    %17 = arith.mulf %16, %16 : vector<8x32xf32>
    %cst_10 = arith.constant dense<0.000000e+00> : vector<8xf32>
    %18 = vector.multi_reduction <add>, %17, %cst_10 [1] : vector<8x32xf32> to vector<8xf32>
    %19 = vector.shape_cast %18 : vector<8xf32> to vector<8x1xf32>
    %cst_11 = arith.constant 3.200000e+01 : f32
    %20 = vector.broadcast %cst_11 : f32 to vector<8x1xf32>
    %21 = arith.divf %19, %20 : vector<8x1xf32>
    %22 = vector.broadcast %14 : vector<8x1xf32> to vector<8x32xf32>
    %23 = arith.subf %7, %22 : vector<8x32xf32>
    %cst_12 = arith.constant 9.99999974E-6 : f32
    %24 = vector.broadcast %cst_12 : f32 to vector<8x1xf32>
    %25 = arith.addf %21, %24 : vector<8x1xf32>
    %26 = math.rsqrt %25 : vector<8x1xf32>
    %27 = vector.broadcast %26 : vector<8x1xf32> to vector<8x32xf32>
    %28 = arith.mulf %23, %27 : vector<8x32xf32>
    %c0_13 = arith.constant 0 : index
    %c0_14 = arith.constant 0 : index
    %29 = vector.load %arg4[%c0_13, %c0_14] : memref<1x32xf32, #tpu.memory_space<vmem>>, vector<1x32xf32>
    %30 = vector.broadcast %29 : vector<1x32xf32> to vector<8x32xf32>
    %31 = arith.mulf %28, %30 : vector<8x32xf32>
    %c0_15 = arith.constant 0 : index
    %c0_16 = arith.constant 0 : index
    %32 = vector.load %arg5[%c0_15, %c0_16] : memref<1x32xf32, #tpu.memory_space<vmem>>, vector<1x32xf32>
    %33 = vector.broadcast %32 : vector<1x32xf32> to vector<8x32xf32>
    %34 = arith.addf %31, %33 : vector<8x32xf32>
    %35 = arith.truncf %34 : vector<8x32xf32> to vector<8x32xbf16>
    %c0_17 = arith.constant 0 : index
    %c0_18 = arith.constant 0 : index
    %36 = vector.load %arg6[%c0_17, %c0_18] : memref<32x128xbf16, #tpu.memory_space<vmem>>, vector<32x128xbf16>
    %cst_19 = arith.constant dense<0.000000e+00> : vector<8x128xf32>
    %37 = tpu.matmul %35, %36, %cst_19 {dimension_numbers = #tpu.dot_dimension_numbers<[1], [0], [0], [1], [0, 0, 1, 1], [], []>} : vector<8x32xbf16>, vector<32x128xbf16>, vector<8x128xf32> -> vector<8x128xf32>
    %38 = vector.extract_strided_slice %37 {offsets = [0, 0], sizes = [8, 64], strides = [1, 1]} : vector<8x128xf32> to vector<8x64xf32>
    %39 = vector.extract_strided_slice %37 {offsets = [0, 64], sizes = [8, 64], strides = [1, 1]} : vector<8x128xf32> to vector<8x64xf32>
    %c0_20 = arith.constant 0 : index
    %c0_21 = arith.constant 0 : index
    %40 = vector.load %arg19[%c0_20, %c0_21] : memref<8x64xf32, #tpu.memory_space<vmem>>, vector<8x64xf32>
    tpu.vector_store %arg19[%c0_20, %c0_21], %39 {strides = array<i32>} : memref<8x64xf32, #tpu.memory_space<vmem>>, vector<8x64xf32>,
    %c8 = arith.constant 8 : index
    %c0_22 = arith.constant 0 : index
    %41 = vector.load %arg17[%c8, %c0_22] : memref<16x64xf32, #tpu.memory_space<vmem>>, vector<8x64xf32>
    tpu.vector_store %arg17[%c8, %c0_22], %38 {strides = array<i32>} : memref<16x64xf32, #tpu.memory_space<vmem>>, vector<8x64xf32>,
    %c0_23 = arith.constant 0 : index
    %c0_24 = arith.constant 0 : index
    %42 = vector.load %arg7[%c0_23, %c0_24] : memref<4x64xf32, #tpu.memory_space<vmem>>, vector<4x64xf32>
    %43 = vector.extract_strided_slice %42 {offsets = [0, 0], sizes = [1, 64], strides = [1, 1]} : vector<4x64xf32> to vector<1x64xf32>
    %c5 = arith.constant 5 : index
    %c0_25 = arith.constant 0 : index
    %44 = vector.load %arg17[%c5, %c0_25] : memref<16x64xf32, #tpu.memory_space<vmem>>, vector<8x64xf32>
    %45 = vector.broadcast %43 : vector<1x64xf32> to vector<8x64xf32>
    %46 = arith.mulf %45, %44 : vector<8x64xf32>
    %47 = vector.extract_strided_slice %42 {offsets = [1, 0], sizes = [1, 64], strides = [1, 1]} : vector<4x64xf32> to vector<1x64xf32>
    %c6 = arith.constant 6 : index
    %c0_26 = arith.constant 0 : index
    %48 = vector.load %arg17[%c6, %c0_26] : memref<16x64xf32, #tpu.memory_space<vmem>>, vector<8x64xf32>
    %49 = vector.broadcast %47 : vector<1x64xf32> to vector<8x64xf32>
    %50 = arith.mulf %49, %48 : vector<8x64xf32>
    %51 = arith.addf %46, %50 : vector<8x64xf32>
    %52 = vector.extract_strided_slice %42 {offsets = [2, 0], sizes = [1, 64], strides = [1, 1]} : vector<4x64xf32> to vector<1x64xf32>
    %c7 = arith.constant 7 : index
    %c0_27 = arith.constant 0 : index
    %53 = vector.load %arg17[%c7, %c0_27] : memref<16x64xf32, #tpu.memory_space<vmem>>, vector<8x64xf32>
    %54 = vector.broadcast %52 : vector<1x64xf32> to vector<8x64xf32>
    %55 = arith.mulf %54, %53 : vector<8x64xf32>
    %56 = arith.addf %51, %55 : vector<8x64xf32>
    %57 = vector.extract_strided_slice %42 {offsets = [3, 0], sizes = [1, 64], strides = [1, 1]} : vector<4x64xf32> to vector<1x64xf32>
    %c8_28 = arith.constant 8 : index
    %c0_29 = arith.constant 0 : index
    %58 = vector.load %arg17[%c8_28, %c0_29] : memref<16x64xf32, #tpu.memory_space<vmem>>, vector<8x64xf32>
    %59 = vector.broadcast %57 : vector<1x64xf32> to vector<8x64xf32>
    %60 = arith.mulf %59, %58 : vector<8x64xf32>
    %61 = arith.addf %56, %60 : vector<8x64xf32>
    %c0_30 = arith.constant 0 : index
    %c0_31 = arith.constant 0 : index
    %62 = vector.load %arg8[%c0_30, %c0_31] : memref<1x64xf32, #tpu.memory_space<vmem>>, vector<1x64xf32>
    %63 = vector.broadcast %62 : vector<1x64xf32> to vector<8x64xf32>
    %64 = arith.addf %61, %63 : vector<8x64xf32>
    %cst_32 = arith.constant 0.000000e+00 : f32
    %65 = vector.broadcast %cst_32 : f32 to vector<8x64xf32>
    %66 = arith.subf %65, %64 : vector<8x64xf32>
    %67 = math.exp %66 : vector<8x64xf32>
    %cst_33 = arith.constant 1.000000e+00 : f32
    %68 = vector.broadcast %cst_33 : f32 to vector<8x64xf32>
    %69 = arith.addf %68, %67 : vector<8x64xf32>
    %70 = tpu.reciprocal %69 {approx = true} : vector<8x64xf32> -> vector<8x64xf32>
    %71 = arith.mulf %64, %70 : vector<8x64xf32>
    %c0_34 = arith.constant 0 : index
    %c0_35 = arith.constant 0 : index
    %72 = vector.load %arg18[%c0_34, %c0_35] : memref<8x64xf32, #tpu.memory_space<vmem>>, vector<8x64xf32>
    tpu.vector_store %arg18[%c0_34, %c0_35], %71 {strides = array<i32>} : memref<8x64xf32, #tpu.memory_space<vmem>>, vector<8x64xf32>,
    %c13 = arith.constant 13 : index
    %c0_36 = arith.constant 0 : index
    %73 = vector.load %arg17[%c13, %c0_36] : memref<16x64xf32, #tpu.memory_space<vmem>>, vector<3x64xf32>
    %c5_37 = arith.constant 5 : index
    %c0_38 = arith.constant 0 : index
    %74 = vector.load %arg17[%c5_37, %c0_38] : memref<16x64xf32, #tpu.memory_space<vmem>>, vector<3x64xf32>
    tpu.vector_store %arg17[%c5_37, %c0_38], %73 {strides = array<i32>} : memref<16x64xf32, #tpu.memory_space<vmem>>, vector<3x64xf32>,
    %75 = arith.truncf %71 : vector<8x64xf32> to vector<8x64xbf16>
    %c0_39 = arith.constant 0 : index
    %c0_40 = arith.constant 0 : index
    %76 = vector.load %arg9[%c0_39, %c0_40] : memref<64x34xbf16, #tpu.memory_space<vmem>>, vector<64x34xbf16>
    %cst_41 = arith.constant dense<0.000000e+00> : vector<8x34xf32>
    %77 = tpu.matmul %75, %76, %cst_41 {dimension_numbers = #tpu.dot_dimension_numbers<[1], [0], [0], [1], [0, 0, 1, 1], [], []>} : vector<8x64xbf16>, vector<64x34xbf16>, vector<8x34xf32> -> vector<8x34xf32>
    %78 = vector.extract_strided_slice %77 {offsets = [0, 0], sizes = [8, 2], strides = [1, 1]} : vector<8x34xf32> to vector<8x2xf32>
    %79 = vector.extract_strided_slice %77 {offsets = [0, 2], sizes = [8, 16], strides = [1, 1]} : vector<8x34xf32> to vector<8x16xf32>
    %c0_42 = arith.constant 0 : index
    %c0_43 = arith.constant 0 : index
    %80 = vector.load %arg21[%c0_42, %c0_43] : memref<8x16xf32, #tpu.memory_space<vmem>>, vector<8x16xf32>
    tpu.vector_store %arg21[%c0_42, %c0_43], %79 {strides = array<i32>} : memref<8x16xf32, #tpu.memory_space<vmem>>, vector<8x16xf32>,
    %81 = vector.extract_strided_slice %77 {offsets = [0, 18], sizes = [8, 16], strides = [1, 1]} : vector<8x34xf32> to vector<8x16xf32>
    %c0_44 = arith.constant 0 : index
    %c0_45 = arith.constant 0 : index
    %82 = vector.load %arg22[%c0_44, %c0_45] : memref<8x16xf32, #tpu.memory_space<vmem>>, vector<8x16xf32>
    tpu.vector_store %arg22[%c0_44, %c0_45], %81 {strides = array<i32>} : memref<8x16xf32, #tpu.memory_space<vmem>>, vector<8x16xf32>,
    %83 = arith.truncf %78 : vector<8x2xf32> to vector<8x2xbf16>
    %c0_46 = arith.constant 0 : index
    %c0_47 = arith.constant 0 : index
    %84 = vector.load %arg10[%c0_46, %c0_47] : memref<2x64xbf16, #tpu.memory_space<vmem>>, vector<2x64xbf16>
    %cst_48 = arith.constant dense<0.000000e+00> : vector<8x64xf32>
    %85 = tpu.matmul %83, %84, %cst_48 {dimension_numbers = #tpu.dot_dimension_numbers<[1], [0], [0], [1], [0, 0, 1, 1], [], []>} : vector<8x2xbf16>, vector<2x64xbf16>, vector<8x64xf32> -> vector<8x64xf32>
    %c0_49 = arith.constant 0 : index
    %c0_50 = arith.constant 0 : index
    %86 = vector.load %arg11[%c0_49, %c0_50] : memref<1x64xf32, #tpu.memory_space<vmem>>, vector<1x64xf32>
    %87 = vector.broadcast %86 : vector<1x64xf32> to vector<8x64xf32>
    %88 = arith.addf %85, %87 : vector<8x64xf32>
    %cst_51 = arith.constant 0.000000e+00 : f32
    %89 = vector.broadcast %cst_51 : f32 to vector<8x64xf32>
    %90 = arith.maximumf %88, %89 : vector<8x64xf32>
    %91 = math.absf %88 : vector<8x64xf32>
    %cst_52 = arith.constant 0.000000e+00 : f32
    %92 = vector.broadcast %cst_52 : f32 to vector<8x64xf32>
    %93 = arith.subf %92, %91 : vector<8x64xf32>
    %94 = math.exp %93 : vector<8x64xf32>
    %cst_53 = arith.constant 1.000000e+00 : f32
    %95 = vector.broadcast %cst_53 : f32 to vector<8x64xf32>
    %96 = arith.addf %95, %94 : vector<8x64xf32>
    %97 = math.log %96 : vector<8x64xf32>
    %98 = arith.addf %90, %97 : vector<8x64xf32>
    %c0_54 = arith.constant 0 : index
    %c0_55 = arith.constant 0 : index
    %99 = vector.load %arg20[%c0_54, %c0_55] : memref<8x64xf32, #tpu.memory_space<vmem>>, vector<8x64xf32>
    tpu.vector_store %arg20[%c0_54, %c0_55], %98 {strides = array<i32>} : memref<8x64xf32, #tpu.memory_space<vmem>>, vector<8x64xf32>,
    %c0_56 = arith.constant 0 : index
    %c0_57 = arith.constant 0 : index
    %100 = vector.load %arg12[%c0_56, %c0_57] : memref<16x64xf32, #tpu.memory_space<vmem>>, vector<16x64xf32>
    %c0_i32_58 = arith.constant 0 : i32
    %c1_i32 = arith.constant 1 : i32
    %101 = arith.muli %c0_i32_58, %c1_i32 : i32
    %c0_i32_59 = arith.constant 0 : i32
    %102 = arith.addi %c0_i32_59, %101 : i32
    %c8_i32 = arith.constant 8 : i32
    %103 = arith.muli %102, %c8_i32 : i32
    %104 = tpu.assume_multiple %103, 8 : i32
    %105 = arith.index_cast %104 : i32 to index
    %c0_60 = arith.constant 0 : index
    %106 = vector.load %arg20[%105, %c0_60] : memref<8x64xf32, #tpu.memory_space<vmem>>, vector<8x64xf32>
    %107 = arith.index_cast %104 : i32 to index
    %c0_61 = arith.constant 0 : index
    %108 = vector.load %arg18[%107, %c0_61] : memref<8x64xf32, #tpu.memory_space<vmem>>, vector<8x64xf32>
    %109 = arith.index_cast %104 : i32 to index
    %c0_62 = arith.constant 0 : index
    %110 = vector.load %arg21[%109, %c0_62] : memref<8x16xf32, #tpu.memory_space<vmem>>, vector<8x16xf32>
    %111 = tpu.transpose %110, [1, 0] : vector<8x16xf32> -> vector<16x8xf32>
    %112 = arith.index_cast %104 : i32 to index
    %c0_63 = arith.constant 0 : index
    %113 = vector.load %arg22[%112, %c0_63] : memref<8x16xf32, #tpu.memory_space<vmem>>, vector<8x16xf32>
    %114 = tpu.transpose %113, [1, 0] : vector<8x16xf32> -> vector<16x8xf32>
    %115 = vector.shape_cast %106 : vector<8x64xf32> to vector<8x1x64xf32>
    %116 = vector.shape_cast %100 : vector<16x64xf32> to vector<1x16x64xf32>
    %117 = vector.broadcast %115 : vector<8x1x64xf32> to vector<8x16x64xf32>
    %118 = vector.broadcast %116 : vector<1x16x64xf32> to vector<8x16x64xf32>
    %119 = arith.mulf %117, %118 : vector<8x16x64xf32>
    %120 = math.exp %119 : vector<8x16x64xf32>
    %121 = arith.mulf %106, %108 : vector<8x64xf32>
    %c0_64 = arith.constant 0 : index
    %c0_65 = arith.constant 0 : index
    %122 = vector.load %arg24[%c0_64, %c0_65] : memref<16x64xf32, #tpu.memory_space<vmem>>, vector<16x64xf32>
    %123 = vector.extract_strided_slice %120 {offsets = [0, 0, 0], sizes = [1, 16, 64], strides = [1, 1, 1]} : vector<8x16x64xf32> to vector<1x16x64xf32>
    %124 = vector.shape_cast %123 : vector<1x16x64xf32> to vector<16x64xf32>
    %125 = arith.mulf %124, %122 : vector<16x64xf32>
    %126 = vector.extract_strided_slice %121 {offsets = [0, 0], sizes = [1, 64], strides = [1, 1]} : vector<8x64xf32> to vector<1x64xf32>
    %127 = vector.extract_strided_slice %111 {offsets = [0, 0], sizes = [16, 1], strides = [1, 1]} : vector<16x8xf32> to vector<16x1xf32>
    %128 = vector.broadcast %126 : vector<1x64xf32> to vector<16x64xf32>
    %129 = vector.broadcast %127 : vector<16x1xf32> to vector<16x64xf32>
    %130 = arith.mulf %128, %129 : vector<16x64xf32>
    %131 = arith.addf %125, %130 : vector<16x64xf32>
    %132 = vector.extract_strided_slice %114 {offsets = [0, 0], sizes = [16, 1], strides = [1, 1]} : vector<16x8xf32> to vector<16x1xf32>
    %133 = vector.broadcast %132 : vector<16x1xf32> to vector<16x64xf32>
    %134 = arith.mulf %131, %133 : vector<16x64xf32>
    %cst_66 = arith.constant dense<0.000000e+00> : vector<64xf32>
    %135 = vector.multi_reduction <add>, %134, %cst_66 [0] : vector<16x64xf32> to vector<64xf32>
    %136 = vector.shape_cast %135 : vector<64xf32> to vector<1x64xf32>
    %137 = vector.extract_strided_slice %120 {offsets = [1, 0, 0], sizes = [1, 16, 64], strides = [1, 1, 1]} : vector<8x16x64xf32> to vector<1x16x64xf32>
    %138 = vector.shape_cast %137 : vector<1x16x64xf32> to vector<16x64xf32>
    %139 = arith.mulf %138, %131 : vector<16x64xf32>
    %140 = vector.extract_strided_slice %121 {offsets = [1, 0], sizes = [1, 64], strides = [1, 1]} : vector<8x64xf32> to vector<1x64xf32>
    %141 = vector.extract_strided_slice %111 {offsets = [0, 1], sizes = [16, 1], strides = [1, 1]} : vector<16x8xf32> to vector<16x1xf32>
    %142 = vector.broadcast %140 : vector<1x64xf32> to vector<16x64xf32>
    %143 = vector.broadcast %141 : vector<16x1xf32> to vector<16x64xf32>
    %144 = arith.mulf %142, %143 : vector<16x64xf32>
    %145 = arith.addf %139, %144 : vector<16x64xf32>
    %146 = vector.extract_strided_slice %114 {offsets = [0, 1], sizes = [16, 1], strides = [1, 1]} : vector<16x8xf32> to vector<16x1xf32>
    %147 = vector.broadcast %146 : vector<16x1xf32> to vector<16x64xf32>
    %148 = arith.mulf %145, %147 : vector<16x64xf32>
    %cst_67 = arith.constant dense<0.000000e+00> : vector<64xf32>
    %149 = vector.multi_reduction <add>, %148, %cst_67 [0] : vector<16x64xf32> to vector<64xf32>
    %150 = vector.shape_cast %149 : vector<64xf32> to vector<1x64xf32>
    %151 = vector.extract_strided_slice %120 {offsets = [2, 0, 0], sizes = [1, 16, 64], strides = [1, 1, 1]} : vector<8x16x64xf32> to vector<1x16x64xf32>
    %152 = vector.shape_cast %151 : vector<1x16x64xf32> to vector<16x64xf32>
    %153 = arith.mulf %152, %145 : vector<16x64xf32>
    %154 = vector.extract_strided_slice %121 {offsets = [2, 0], sizes = [1, 64], strides = [1, 1]} : vector<8x64xf32> to vector<1x64xf32>
    %155 = vector.extract_strided_slice %111 {offsets = [0, 2], sizes = [16, 1], strides = [1, 1]} : vector<16x8xf32> to vector<16x1xf32>
    %156 = vector.broadcast %154 : vector<1x64xf32> to vector<16x64xf32>
    %157 = vector.broadcast %155 : vector<16x1xf32> to vector<16x64xf32>
    %158 = arith.mulf %156, %157 : vector<16x64xf32>
    %159 = arith.addf %153, %158 : vector<16x64xf32>
    %160 = vector.extract_strided_slice %114 {offsets = [0, 2], sizes = [16, 1], strides = [1, 1]} : vector<16x8xf32> to vector<16x1xf32>
    %161 = vector.broadcast %160 : vector<16x1xf32> to vector<16x64xf32>
    %162 = arith.mulf %159, %161 : vector<16x64xf32>
    %cst_68 = arith.constant dense<0.000000e+00> : vector<64xf32>
    %163 = vector.multi_reduction <add>, %162, %cst_68 [0] : vector<16x64xf32> to vector<64xf32>
    %164 = vector.shape_cast %163 : vector<64xf32> to vector<1x64xf32>
    %165 = vector.extract_strided_slice %120 {offsets = [3, 0, 0], sizes = [1, 16, 64], strides = [1, 1, 1]} : vector<8x16x64xf32> to vector<1x16x64xf32>
    %166 = vector.shape_cast %165 : vector<1x16x64xf32> to vector<16x64xf32>
    %167 = arith.mulf %166, %159 : vector<16x64xf32>
    %168 = vector.extract_strided_slice %121 {offsets = [3, 0], sizes = [1, 64], strides = [1, 1]} : vector<8x64xf32> to vector<1x64xf32>
    %169 = vector.extract_strided_slice %111 {offsets = [0, 3], sizes = [16, 1], strides = [1, 1]} : vector<16x8xf32> to vector<16x1xf32>
    %170 = vector.broadcast %168 : vector<1x64xf32> to vector<16x64xf32>
    %171 = vector.broadcast %169 : vector<16x1xf32> to vector<16x64xf32>
    %172 = arith.mulf %170, %171 : vector<16x64xf32>
    %173 = arith.addf %167, %172 : vector<16x64xf32>
    %174 = vector.extract_strided_slice %114 {offsets = [0, 3], sizes = [16, 1], strides = [1, 1]} : vector<16x8xf32> to vector<16x1xf32>
    %175 = vector.broadcast %174 : vector<16x1xf32> to vector<16x64xf32>
    %176 = arith.mulf %173, %175 : vector<16x64xf32>
    %cst_69 = arith.constant dense<0.000000e+00> : vector<64xf32>
    %177 = vector.multi_reduction <add>, %176, %cst_69 [0] : vector<16x64xf32> to vector<64xf32>
    %178 = vector.shape_cast %177 : vector<64xf32> to vector<1x64xf32>
    %179 = vector.extract_strided_slice %120 {offsets = [4, 0, 0], sizes = [1, 16, 64], strides = [1, 1, 1]} : vector<8x16x64xf32> to vector<1x16x64xf32>
    %180 = vector.shape_cast %179 : vector<1x16x64xf32> to vector<16x64xf32>
    %181 = arith.mulf %180, %173 : vector<16x64xf32>
    %182 = vector.extract_strided_slice %121 {offsets = [4, 0], sizes = [1, 64], strides = [1, 1]} : vector<8x64xf32> to vector<1x64xf32>
    %183 = vector.extract_strided_slice %111 {offsets = [0, 4], sizes = [16, 1], strides = [1, 1]} : vector<16x8xf32> to vector<16x1xf32>
    %184 = vector.broadcast %182 : vector<1x64xf32> to vector<16x64xf32>
    %185 = vector.broadcast %183 : vector<16x1xf32> to vector<16x64xf32>
    %186 = arith.mulf %184, %185 : vector<16x64xf32>
    %187 = arith.addf %181, %186 : vector<16x64xf32>
    %188 = vector.extract_strided_slice %114 {offsets = [0, 4], sizes = [16, 1], strides = [1, 1]} : vector<16x8xf32> to vector<16x1xf32>
    %189 = vector.broadcast %188 : vector<16x1xf32> to vector<16x64xf32>
    %190 = arith.mulf %187, %189 : vector<16x64xf32>
    %cst_70 = arith.constant dense<0.000000e+00> : vector<64xf32>
    %191 = vector.multi_reduction <add>, %190, %cst_70 [0] : vector<16x64xf32> to vector<64xf32>
    %192 = vector.shape_cast %191 : vector<64xf32> to vector<1x64xf32>
    %193 = vector.extract_strided_slice %120 {offsets = [5, 0, 0], sizes = [1, 16, 64], strides = [1, 1, 1]} : vector<8x16x64xf32> to vector<1x16x64xf32>
    %194 = vector.shape_cast %193 : vector<1x16x64xf32> to vector<16x64xf32>
    %195 = arith.mulf %194, %187 : vector<16x64xf32>
    %196 = vector.extract_strided_slice %121 {offsets = [5, 0], sizes = [1, 64], strides = [1, 1]} : vector<8x64xf32> to vector<1x64xf32>
    %197 = vector.extract_strided_slice %111 {offsets = [0, 5], sizes = [16, 1], strides = [1, 1]} : vector<16x8xf32> to vector<16x1xf32>
    %198 = vector.broadcast %196 : vector<1x64xf32> to vector<16x64xf32>
    %199 = vector.broadcast %197 : vector<16x1xf32> to vector<16x64xf32>
    %200 = arith.mulf %198, %199 : vector<16x64xf32>
    %201 = arith.addf %195, %200 : vector<16x64xf32>
    %202 = vector.extract_strided_slice %114 {offsets = [0, 5], sizes = [16, 1], strides = [1, 1]} : vector<16x8xf32> to vector<16x1xf32>
    %203 = vector.broadcast %202 : vector<16x1xf32> to vector<16x64xf32>
    %204 = arith.mulf %201, %203 : vector<16x64xf32>
    %cst_71 = arith.constant dense<0.000000e+00> : vector<64xf32>
    %205 = vector.multi_reduction <add>, %204, %cst_71 [0] : vector<16x64xf32> to vector<64xf32>
    %206 = vector.shape_cast %205 : vector<64xf32> to vector<1x64xf32>
    %207 = vector.extract_strided_slice %120 {offsets = [6, 0, 0], sizes = [1, 16, 64], strides = [1, 1, 1]} : vector<8x16x64xf32> to vector<1x16x64xf32>
    %208 = vector.shape_cast %207 : vector<1x16x64xf32> to vector<16x64xf32>
    %209 = arith.mulf %208, %201 : vector<16x64xf32>
    %210 = vector.extract_strided_slice %121 {offsets = [6, 0], sizes = [1, 64], strides = [1, 1]} : vector<8x64xf32> to vector<1x64xf32>
    %211 = vector.extract_strided_slice %111 {offsets = [0, 6], sizes = [16, 1], strides = [1, 1]} : vector<16x8xf32> to vector<16x1xf32>
    %212 = vector.broadcast %210 : vector<1x64xf32> to vector<16x64xf32>
    %213 = vector.broadcast %211 : vector<16x1xf32> to vector<16x64xf32>
    %214 = arith.mulf %212, %213 : vector<16x64xf32>
    %215 = arith.addf %209, %214 : vector<16x64xf32>
    %216 = vector.extract_strided_slice %114 {offsets = [0, 6], sizes = [16, 1], strides = [1, 1]} : vector<16x8xf32> to vector<16x1xf32>
    %217 = vector.broadcast %216 : vector<16x1xf32> to vector<16x64xf32>
    %218 = arith.mulf %215, %217 : vector<16x64xf32>
    %cst_72 = arith.constant dense<0.000000e+00> : vector<64xf32>
    %219 = vector.multi_reduction <add>, %218, %cst_72 [0] : vector<16x64xf32> to vector<64xf32>
    %220 = vector.shape_cast %219 : vector<64xf32> to vector<1x64xf32>
    %221 = vector.extract_strided_slice %120 {offsets = [7, 0, 0], sizes = [1, 16, 64], strides = [1, 1, 1]} : vector<8x16x64xf32> to vector<1x16x64xf32>
    %222 = vector.shape_cast %221 : vector<1x16x64xf32> to vector<16x64xf32>
    %223 = arith.mulf %222, %215 : vector<16x64xf32>
    %224 = vector.extract_strided_slice %121 {offsets = [7, 0], sizes = [1, 64], strides = [1, 1]} : vector<8x64xf32> to vector<1x64xf32>
    %225 = vector.extract_strided_slice %111 {offsets = [0, 7], sizes = [16, 1], strides = [1, 1]} : vector<16x8xf32> to vector<16x1xf32>
    %226 = vector.broadcast %224 : vector<1x64xf32> to vector<16x64xf32>
    %227 = vector.broadcast %225 : vector<16x1xf32> to vector<16x64xf32>
    %228 = arith.mulf %226, %227 : vector<16x64xf32>
    %229 = arith.addf %223, %228 : vector<16x64xf32>
    %230 = vector.extract_strided_slice %114 {offsets = [0, 7], sizes = [16, 1], strides = [1, 1]} : vector<16x8xf32> to vector<16x1xf32>
    %231 = vector.broadcast %230 : vector<16x1xf32> to vector<16x64xf32>
    %232 = arith.mulf %229, %231 : vector<16x64xf32>
    %cst_73 = arith.constant dense<0.000000e+00> : vector<64xf32>
    %233 = vector.multi_reduction <add>, %232, %cst_73 [0] : vector<16x64xf32> to vector<64xf32>
    %234 = vector.shape_cast %233 : vector<64xf32> to vector<1x64xf32>
    %c0_74 = arith.constant 0 : index
    %c0_75 = arith.constant 0 : index
    %235 = vector.load %arg24[%c0_74, %c0_75] : memref<16x64xf32, #tpu.memory_space<vmem>>, vector<16x64xf32>
    tpu.vector_store %arg24[%c0_74, %c0_75], %229 {strides = array<i32>} : memref<16x64xf32, #tpu.memory_space<vmem>>, vector<16x64xf32>,
    %236 = tpu.concatenate %136, %150, %164, %178, %192, %206, %220, %234 in 0 : vector<1x64xf32>, vector<1x64xf32>, vector<1x64xf32>, vector<1x64xf32>, vector<1x64xf32>, vector<1x64xf32>, vector<1x64xf32>, vector<1x64xf32> -> vector<8x64xf32>
    %237 = arith.index_cast %104 : i32 to index
    %c0_76 = arith.constant 0 : index
    %238 = vector.load %arg23[%237, %c0_76] : memref<8x64xf32, #tpu.memory_space<vmem>>, vector<8x64xf32>
    tpu.vector_store %arg23[%237, %c0_76], %236 {strides = array<i32>} : memref<8x64xf32, #tpu.memory_space<vmem>>, vector<8x64xf32>,
    %c1_i32_77 = arith.constant 1 : i32
    %c0_78 = arith.constant 0 : index
    %c0_79 = arith.constant 0 : index
    %239 = vector.load %arg19[%c0_78, %c0_79] : memref<8x64xf32, #tpu.memory_space<vmem>>, vector<8x64xf32>
    %c0_80 = arith.constant 0 : index
    %c0_81 = arith.constant 0 : index
    %240 = vector.load %arg23[%c0_80, %c0_81] : memref<8x64xf32, #tpu.memory_space<vmem>>, vector<8x64xf32>
    %c0_82 = arith.constant 0 : index
    %c0_83 = arith.constant 0 : index
    %241 = vector.load %arg18[%c0_82, %c0_83] : memref<8x64xf32, #tpu.memory_space<vmem>>, vector<8x64xf32>
    %c0_84 = arith.constant 0 : index
    %c0_85 = arith.constant 0 : index
    %242 = vector.load %arg13[%c0_84, %c0_85] : memref<1x64xf32, #tpu.memory_space<vmem>>, vector<1x64xf32>
    %243 = vector.broadcast %242 : vector<1x64xf32> to vector<8x64xf32>
    %244 = arith.mulf %241, %243 : vector<8x64xf32>
    %245 = arith.addf %240, %244 : vector<8x64xf32>
    %cst_86 = arith.constant 0.000000e+00 : f32
    %246 = vector.broadcast %cst_86 : f32 to vector<8x64xf32>
    %247 = arith.subf %246, %239 : vector<8x64xf32>
    %248 = math.exp %247 : vector<8x64xf32>
    %cst_87 = arith.constant 1.000000e+00 : f32
    %249 = vector.broadcast %cst_87 : f32 to vector<8x64xf32>
    %250 = arith.addf %249, %248 : vector<8x64xf32>
    %251 = tpu.reciprocal %250 {approx = true} : vector<8x64xf32> -> vector<8x64xf32>
    %252 = arith.mulf %239, %251 : vector<8x64xf32>
    %253 = arith.mulf %245, %252 : vector<8x64xf32>
    %254 = arith.truncf %253 : vector<8x64xf32> to vector<8x64xbf16>
    %c0_88 = arith.constant 0 : index
    %c0_89 = arith.constant 0 : index
    %255 = vector.load %arg14[%c0_88, %c0_89] : memref<64x32xbf16, #tpu.memory_space<vmem>>, vector<64x32xbf16>
    %cst_90 = arith.constant dense<0.000000e+00> : vector<8x32xf32>
    %256 = tpu.matmul %254, %255, %cst_90 {dimension_numbers = #tpu.dot_dimension_numbers<[1], [0], [0], [1], [0, 0, 1, 1], [], []>} : vector<8x64xbf16>, vector<64x32xbf16>, vector<8x32xf32> -> vector<8x32xf32>
    %c0_91 = arith.constant 0 : index
    %c0_92 = arith.constant 0 : index
    %c0_93 = arith.constant 0 : index
    %257 = vector.load %arg15[%c0_91, %c0_92, %c0_93] : memref<1x8x32xf32, #tpu.memory_space<vmem>>, vector<1x8x32xf32>
    %258 = vector.shape_cast %257 : vector<1x8x32xf32> to vector<8x32xf32>
    %259 = vector.shape_cast %256 : vector<8x32xf32> to vector<1x8x32xf32>
    tpu.vector_store %arg15[%c0_91, %c0_92, %c0_93], %259 {strides = array<i32>} : memref<1x8x32xf32, #tpu.memory_space<vmem>>, vector<1x8x32xf32>,
    return
  }
  func.func @transform_0(%arg0: i32, %arg1: i32) -> (i32, i32, i32) {
    %c0_i32 = arith.constant 0 : i32
    %c0_i32_0 = arith.constant 0 : i32
    return %arg0, %arg1, %c0_i32 : i32, i32, i32
  }
  func.func @transform_1(%arg0: i32, %arg1: i32) -> (i32, i32, i32) {
    %c0_i32 = arith.constant 0 : i32
    %c0_i32_0 = arith.constant 0 : i32
    return %arg0, %arg1, %c0_i32 : i32, i32, i32
  }
  func.func @transform_2(%arg0: i32, %arg1: i32) -> (i32, i32) {
    %c0_i32 = arith.constant 0 : i32
    %c0_i32_0 = arith.constant 0 : i32
    %c0_i32_1 = arith.constant 0 : i32
    return %c0_i32, %c0_i32_0 : i32, i32
  }
  func.func @transform_3(%arg0: i32, %arg1: i32) -> (i32, i32) {
    %c0_i32 = arith.constant 0 : i32
    %c0_i32_0 = arith.constant 0 : i32
    %c0_i32_1 = arith.constant 0 : i32
    return %c0_i32, %c0_i32_0 : i32, i32
  }
  func.func @transform_4(%arg0: i32, %arg1: i32) -> (i32, i32) {
    %c0_i32 = arith.constant 0 : i32
    %c0_i32_0 = arith.constant 0 : i32
    %c0_i32_1 = arith.constant 0 : i32
    return %c0_i32, %c0_i32_0 : i32, i32
  }
  func.func @transform_5(%arg0: i32, %arg1: i32) -> (i32, i32) {
    %c0_i32 = arith.constant 0 : i32
    %c0_i32_0 = arith.constant 0 : i32
    %c0_i32_1 = arith.constant 0 : i32
    return %c0_i32, %c0_i32_0 : i32, i32
  }
  func.func @transform_6(%arg0: i32, %arg1: i32) -> (i32, i32) {
    %c0_i32 = arith.constant 0 : i32
    %c0_i32_0 = arith.constant 0 : i32
    %c0_i32_1 = arith.constant 0 : i32
    return %c0_i32, %c0_i32_0 : i32, i32
  }
  func.func @transform_7(%arg0: i32, %arg1: i32) -> (i32, i32) {
    %c0_i32 = arith.constant 0 : i32
    %c0_i32_0 = arith.constant 0 : i32
    %c0_i32_1 = arith.constant 0 : i32
    return %c0_i32, %c0_i32_0 : i32, i32
  }
  func.func @transform_8(%arg0: i32, %arg1: i32) -> (i32, i32) {
    %c0_i32 = arith.constant 0 : i32
    %c0_i32_0 = arith.constant 0 : i32
    %c0_i32_1 = arith.constant 0 : i32
    return %c0_i32, %c0_i32_0 : i32, i32
  }
  func.func @transform_9(%arg0: i32, %arg1: i32) -> (i32, i32) {
    %c0_i32 = arith.constant 0 : i32
    %c0_i32_0 = arith.constant 0 : i32
    %c0_i32_1 = arith.constant 0 : i32
    return %c0_i32, %c0_i32_0 : i32, i32
  }
  func.func @transform_10(%arg0: i32, %arg1: i32) -> (i32, i32) {
    %c0_i32 = arith.constant 0 : i32
    %c0_i32_0 = arith.constant 0 : i32
    %c0_i32_1 = arith.constant 0 : i32
    return %c0_i32, %c0_i32_0 : i32, i32
  }
  func.func @transform_11(%arg0: i32, %arg1: i32) -> (i32, i32) {
    %c0_i32 = arith.constant 0 : i32
    %c0_i32_0 = arith.constant 0 : i32
    %c0_i32_1 = arith.constant 0 : i32
    return %c0_i32, %c0_i32_0 : i32, i32
  }
  func.func @transform_12(%arg0: i32, %arg1: i32) -> (i32, i32) {
    %c0_i32 = arith.constant 0 : i32
    %c0_i32_0 = arith.constant 0 : i32
    %c0_i32_1 = arith.constant 0 : i32
    return %c0_i32, %c0_i32_0 : i32, i32
  }
  func.func @transform_13(%arg0: i32, %arg1: i32) -> (i32, i32, i32) {
    %c0_i32 = arith.constant 0 : i32
    %c0_i32_0 = arith.constant 0 : i32
    return %arg0, %arg1, %c0_i32 : i32, i32, i32
  }
  func.func @transform_14(%arg0: i32, %arg1: i32) -> (i32, i32, i32) {
    %c0_i32 = arith.constant 0 : i32
    %c0_i32_0 = arith.constant 0 : i32
    return %arg0, %arg1, %c0_i32 : i32, i32, i32
  }
}

</mosaic_0001>

<bundles_post_ra>
// kernel: block_forward.1
= control target key start
LH: loop header
LB: loop body
LE: loop exit
PB: predicated region body
PF: predicated region fallthrough
CT: control target
= control target key end

     0   :  { %s2527_s0 = inlined_call_operand.vmem [shape: f32[2,8,32], index: 0, kind: input, shape index: {}]   ;;  %s2528_s1 = inlined_call_operand.vmem [shape: f32[2,8,32], index: 1, kind: input, shape index: {}]   ;;  %s2529_s2 = inlined_call_operand.vmem [shape: f32[1,32], index: 2, kind: input, shape index: {}]   ;;  %s2530_s3 = inlined_call_operand.vmem [shape: f32[1,32], index: 3, kind: input, shape index: {}]   ;;  %s2531_s4 = inlined_call_operand.vmem [shape: bf16[32,128], index: 4, kind: input, shape index: {}]   ;;  %s2532_s5 = inlined_call_operand.vmem [shape: f32[4,64], index: 5, kind: input, shape index: {}]   ;;  %s2533_s6 = inlined_call_operand.vmem [shape: f32[1,64], index: 6, kind: input, shape index: {}]   ;;  %s2534_s7 = inlined_call_operand.vmem [shape: bf16[64,34], index: 7, kind: input, shape index: {}]   ;;  %s2535_s8 = inlined_call_operand.vmem [shape: bf16[2,64], index: 8, kind: input, shape index: {}]   ;;  %s2536_s9 = inlined_call_operand.vmem [shape: f32[1,64], index: 9, kind: input, shape index: {}]   ;;  %s2537_s10 = inlined_call_operand.vmem [shape: f32[16,64], index: 10, kind: input, shape index: {}]   ;;  %s2538_s11 = inlined_call_operand.vmem [shape: f32[1,64], index: 11, kind: input, shape index: {}]   ;;  %s2539_s12 = inlined_call_operand.vmem [shape: bf16[64,32], index: 12, kind: input, shape index: {}]   ;;  %s2540_s13 = inlined_call_operand.hbm [shape: f32[2,8,32], index: 13, kind: output, shape index: {0}]   ;;  %s2541_s14 = inlined_call_operand.hbm [shape: f32[2,8,32], index: 14, kind: output, shape index: {1}]  }
   0x1   :  { %2547 = sst [smem:[#allocation19_spill]] %s2527_s0 }
   0x2   :  { %2548 = sst [smem:[#allocation20_spill]] %s2528_s1 }
   0x3   :  { %2549 = sst [smem:[#allocation21_spill]] %s2529_s2 }
   0x4   :  { %2550 = sst [smem:[#allocation22_spill]] %s2530_s3 }
   0x5   :  { %2551 = sst [smem:[#allocation23_spill]] %s2531_s4 }
   0x6   :  { %20 = vsyncpa [#allocation11], 0 }
   0x7   :  { %22 = vsyncpa [#allocation11 + $0x1], 0 }
   0x8   :  { %23 = vsyncpa [#allocation13], 0 }
   0x9   :  { %25 = vsyncpa [#allocation13 + $0x1], 0  ;;  %s2064_s29 = smov 0   ;;  %s2066_s30 = smov 0  }
   0xa   :  { %s2068_s15 = smov 0   ;;  %s2070_s16 = smov 0  }
   0xb   :  { %s2072_s17 = smov 0   ;;  %s2074_s18 = smov 0  }
   0xc LB: > { %2552 = sst [smem:[#allocation16_spill]] %s1951_s29  ;;  %s1615_s19 = sadd.s32 4294967295, %s1971_s18   ;;  %s1971_s18 = sphi %s2074_s18, %s31_s18   ;;  %s1967_s17 = sphi %s2072_s17, %s2566_s17   ;;  %s1963_s16 = sphi %s2070_s16, %s2565_s16   ;;  %s1959_s15 = sphi %s2068_s15, %s2569_s15   ;;  %s1955_s30 = sphi %s2066_s30, %s2568_s30   ;;  %s1951_s29 = sphi %s2064_s29, %s2567_s29  }
   0xd   : > { %2553 = sst [smem:[#allocation17_spill]] %s1967_s17  ;;  %s1616_s20 = sadd.s32 4294967294, %s1971_s18  }
   0xe   : > { %s43_s21 = sadd.s32 1, %s1967_s17  ;;  %s339_s22 = sadd.s32 1, %s1959_s15 }
   0xf   : > { %p45_p0 = scmp.ge.s32.totalorder %s43_s21, 2  ;;  %p349_p1 = scmp.ne.s32.totalorder %s1959_s15, %s1955_s30 }
  0x10   : > { %p350_p2 = scmp.eq.s32.totalorder %s1615_s19, 1  ;;  %p355_p3 = scmp.ne.s32.totalorder %s1955_s30, %s1951_s29 }
  0x11   : > { %s2571_s21 = smov (%p45_p0, %s43_s21), 0  ;;  %p356_p5 = scmp.eq.s32.totalorder %s1616_s20, 1 }
  0x12   : > { %2554 = sst [smem:[#allocation18_spill]] %s2571_s21  ;;  %p2104_p4 = por %p350_p2, %p349_p1 }
  0x13   : > { %s334_s24 = ssub.s32 %s1967_s17, %s2571_s21  ;;  %p1619_p6 = scmp.ge.s32.totalorder %s1971_s18, 1 }
  0x14   : > { %p337_p7 = scmp.eq.s32.totalorder %s334_s24, 0  ;;  %p2111_p8 = por %p356_p5, %p355_p3 }
  0x15   : > { %p455_p9 = scmp.lt.s32.totalorder %s1971_s18, 3 }
  0x16   : > { %s2117_s26 = scalar_select %p337_p7, %s1959_s15, %s339_s22  }
  0x17   : > { %p456_p10 = pnand %p1619_p6, %p455_p9 }
  0x18   : > { %p515_p11 = scmp.lt.s32.totalorder (!%p456_p10), %s1963_s16, 1  ;;  %s2557_s0 = sld [smem:[#allocation19_spill]] (!%p456_p10) }
  0x19   : > { %459 = sbr.rel (%p456_p10) target bundleno = 1509 (0x5e5), region = 72  ;;  %s2558_s1 = sld [smem:[#allocation20_spill]] (!%p456_p10) }
  0x1a   : > { %s2559_s4 = sld [smem:[#allocation23_spill]] (!%p456_p10)  ;;  %s1977_s19 = smov (!%p456_p10), 110  }
  0x1b   : > { %s2560_s2 = sld [smem:[#allocation21_spill]] (!%p456_p10) }
  0x1c   : > { %s2561_s3 = sld [smem:[#allocation22_spill]] (!%p456_p10) }
  0x1e   : > { %s516_s27 = scalar_select %p515_p11, %s1963_s16, 1  ;;  %vm541_vm0 = vcmask 261120   ;;  %v1973_v10 = vmov 0.0   ;;  %vm1974_vm1 = vmmov 0   ;;  %vm534_vm2 = vcmask 523264   ;;  %v1810_v22 = vld [vmem:[%s2534_s7 + $0x18] sm:$0xff]  }
  0x1f   : > { %1664 = vmatprep.subr.bf16.mxu1 %v1973_v10  ;;  %1668 = vmatprep.mubr.msk.bf16.mxu1 %vm1974_vm1, %v1973_v10  ;;  %535 = vst.msk [vmem:[#allocation9] sm:$0xff] %vm534_vm2, %v1973_v10  ;;  %536 = vst.msk [vmem:[#allocation9 + $0x8] sm:$0xff] %vm534_vm2, %v1973_v10  ;;  %v1811_v23 = vld [vmem:[%s2534_s7 + $0x10] sm:$0xff]   ;;  %v1812_v24 = vld [vmem:[%s2534_s7 + $0x8] sm:$0xff]   ;;  %v642_v26 = vlaneseq  ;;  %vm684_vm3 = vcmask 518144   ;;  %vm785_vm4 = vcmask 1040384  }
  0x20   : > { %s1622_s28 = sshll.u32 %s516_s27, 3  ;;  %v1808_v9 = vld [vmem:[%s2559_s4 + $0x8] sm:$0xff]   ;;  %v1809_v11 = vld [vmem:[%s2559_s4] sm:$0xff]   ;;  %1684 = vmatprep.subr.bf16.mxu0 %v1973_v10  ;;  %1686 = vmatprep.mubr.msk.bf16.mxu0 %vm1974_vm1, %v1973_v10  ;;  %537 = vst.msk [vmem:[#allocation2] sm:$0xff] %vm534_vm2, %v1973_v10  ;;  %vm781_vm5 = vcmask 15360   ;;  %vm766_vm6 = vcmask 130048  }
  0x21   : > { %s521_s20 = scalar_lea.vmem %s2557_s0, %s1622_s28  ;;  %s528_s17 = scalar_lea.vmem %s2558_s1, %s1622_s28  ;;  %1665 = vmatpush3.bf16.msra.mxu1 %v1808_v9  ;;  %v1624_v16 = vld [vmem:[%s2560_s2] ss:$0 sm:$0xff]  ;;  %v2177_v27 = vshrl.u32 %v642_v26, 7  ;;  %vm1353_vm7 = vcmask 1041408   ;;  %vm1355_vm8 = vcmask 1042432   ;;  %vm1357_vm9 = vcmask 1043456  }
  0x22   : > { %v538_v0 = vld [vmem:[%s521_s20] sm:$0xff]  ;;  %1666 = vmatprep.subr.bf16.mxu1 %v1973_v10  ;;  %s1975_s20 = smov 64   ;;  %s1976_s28 = smov 126   ;;  %vm1359_vm10 = vcmask 1044480   ;;  %vm1361_vm11 = vcmask 1045504   ;;  %vm1363_vm12 = vcmask 1046528  }
  0x23   : > { %v539_v1 = vld [vmem:[%s528_s17] sm:$0xff]  ;;  %v2181_v29 = vsub.s32 0, %v2177_v27  ;;  %v650_v30 = vsub.s32 1, %v2177_v27  ;;  %v657_v33 = vsub.s32 2, %v2177_v27  ;;  %v664_v37 = vsub.s32 3, %v2177_v27  ;;  %s1987_s1 = smov [#allocation12]  }
  0x24   : > { %v2127_v2 = vadd.f32 %v539_v1, %v538_v0  ;;  %v1625_v18 = vld [vmem:[%s2561_s3] ss:$0 sm:$0xff]  ;;  %s1869_s2 = sshll.u32 %s1987_s1, 4  ;;  %s1870_s2 = int_to_ptr.vmem [resolvable:$false] %s1869_s2 }
  0x25   : > { %1667 = vmatpush3.bf16.msra.mxu1 %v1809_v11  ;;  %v1813_v25 = vld [vmem:[%s2534_s7] sm:$0xff]  }
  0x26   : > { %v543_v3 = vsel %vm541_vm0, %v2127_v2, 0.0  ;;  %1672 = vmatprep.subr.bf16.mxu1 %v1973_v10  ;;  %v640_v32 = vld [vmem:[%s2532_s5] sm:$0xf] }
  0x27   : > { %544 = vadd.xlane.f32.xlu0 %v543_v3  ;;  %v645_v35 = vrot.slane %v640_v32, %v2181_v29  ;;  %v651_v36 = vrot.slane %v640_v32, %v650_v30  ;;  %v658_v39 = vrot.slane %v640_v32, %v657_v33  ;;  %v665_v46 = vrot.slane %v640_v32, %v664_v37  ;;  %v1629_v52 = vld [vmem:[%s2533_s6] ss:$0 sm:$0xff] }
  0x28   : > { %v773_v63 = vld [vmem:[%s2535_s8] sm:$0x1] }
  0x29   : > { %v787_v0 = vsel %vm785_vm4, %v773_v63, 0 }
  0x2a   : > { %1685 = vmatpush3.bf16.msra.mxu0 %v787_v0 }
  0x2b   : > { %1690 = vmatprep.subr.bf16.mxu0 %v1973_v10 }
  0xb0   : > { %v545_v4 = vpop.xlane.xlu0 %544 }
  0xb1   : > { %v547_v5 = vmul.f32 0.03125, %v545_v4 }
  0xb3   : > { %v548_v6 = vsub.f32 %v2127_v2, %v547_v5 }
  0xb5   : > { %v549_v7 = vmul.f32 %v548_v6, %v548_v6 }
  0xb7   : > { %v550_v8 = vsel %vm541_vm0, %v549_v7, 0.0 }
  0xb8   : > { %551 = vadd.xlane.f32.xlu0 %v550_v8 }
 0x141   : > { %v552_v12 = vpop.xlane.xlu0 %551 }
 0x142   : > { %v553_v13 = vmul.f32 0.03125, %v552_v12  ;;  %v1978_v12 = vmov 0  }
 0x144   : > { %v554_v14 = vadd.f32 1e-05, %v553_v13  ;;  %v1979_v13 = vmov 3  }
 0x146   : > { %1819 = vrsqrt.f32 %v554_v14  ;;  %v1635_v14 = vld [vmem:[%s2536_s9] ss:$0 sm:$0xff] }
 0x153   : > { %v1820_v15 = vpop.eup %1819 }
 0x154   : > { %v556_v17 = vmul.f32 %v1820_v15, %v548_v6 }
 0x156   : > { %v564_v19 = vmul.f32 %v1624_v16, %v556_v17 }
 0x158   : > { %v572_v20 = vadd.f32 %v1625_v18, %v564_v19 }
 0x15a   : > { %v573_v21 = vpack.c.bf16 %v572_v20, %v572_v20 }
 0x15c   : > { %1669 = vmatmul.mubr.msk.bf16.vlgmr.msra.gmra.mxu1 %vm541_vm0, %v573_v21 }
 0x15d   : > { %1680 = vmatprep.mubr.msk.bf16.mxu1 %vm1974_vm1, %v1973_v10  ;;  %1673 = vmatpush3.bf16.msra.mxu1 %v1810_v22 }
 0x15e   : > { %1674 = vmatprep.subr.bf16.mxu1 %v1973_v10 }
 0x161   : > { %1675 = vmatpush3.bf16.msra.mxu1 %v1811_v23 }
 0x162   : > { %1676 = vmatprep.subr.bf16.mxu1 %v1973_v10 }
 0x165   : > { %1677 = vmatpush3.bf16.msra.mxu1 %v1812_v24 }
 0x166   : > { %1678 = vmatprep.subr.bf16.mxu1 %v1973_v10 }
 0x169   : > { %1679 = vmatpush3.bf16.msra.mxu1 %v1813_v25 }
 0x21c   : > { %v627_v28 = vpop.f32.mrf.mxu1 }
 0x21d   : > { %639 = vst.msk [vmem:[#allocation2 + $0x8] sm:$0xff] %vm534_vm2, %v627_v28  ;;  %634 = vrot.lane.b32.xlu0 %v627_v28, %s1975_s20 }
 0x21e   : > { %v1670_v31 = vpop.f32.mrf.mxu1 }
 0x220   : > { %v630_v34 = vpop.f32.mrf.mxu1 }
 0x222   : > { %v1671_v38 = vpop.f32.mrf.mxu1 }
 0x223   : > { %v1982_v38 = vmov 7  }
 0x224   : > { %v683_v40 = vld [vmem:[#allocation2 + $0xd] sm:$0x7]  ;;  %v641_v41 = vld [vmem:[#allocation2 + $0x5] sm:$0xff] }
 0x225   : > { %v647_v42 = vld [vmem:[#allocation2 + $0x6] sm:$0xff]  ;;  %v646_v43 = vmul.f32 %v645_v35, %v641_v41  ;;  %v1980_v35 = vmov 1  }
 0x226   : > { %v652_v44 = vmul.f32 %v651_v36, %v647_v42  ;;  %v654_v45 = vld [vmem:[#allocation2 + $0x7] sm:$0xff]  ;;  %v1981_v36 = vmov 2   ;;  %v1985_v42 = vmov 5  }
 0x227   : > { %v661_v47 = vld [vmem:[#allocation2 + $0x8] sm:$0xff]  ;;  %685 = vst.msk [vmem:[#allocation2 + $0x5] sm:$0x7] %vm684_vm3, %v683_v40  ;;  %v659_v49 = vmul.f32 %v658_v39, %v654_v45  ;;  %v1983_v39 = vmov 4   ;;  %v1984_v40 = vmov 6  }
 0x228   : > { %v653_v48 = vadd.f32 %v652_v44, %v646_v43  ;;  %v666_v51 = vmul.f32 %v665_v46, %v661_v47  ;;  %v1986_v44 = vmov 1966171168  }
 0x229   : > { %v912_v45 = vunpack.c.l.s4 %v1986_v44 }
 0x22a   : > { %v660_v50 = vadd.f32 %v659_v49, %v653_v48 }
 0x22b   : > { %v913_v46 = vunpack.c.0.s8 %v912_v45 }
 0x22c   : > { %v667_v53 = vadd.f32 %v666_v51, %v660_v50 }
 0x22d   : > { %v916_v47 = vsub.s32 %v913_v46, %v2177_v27 }
 0x22e   : > { %v675_v54 = vadd.f32 %v1629_v52, %v667_v53  ;;  %v2240_v53 = vld [vmem:[%s2537_s10] sm:$0xff] }
 0x230   : > { %v676_v55 = vsub.f32 0.0, %v675_v54 }
 0x232   : > { %v677_v56 = vmul.f32 1.442695, %v676_v55 }
 0x234   : > { %1821 = vpow2.f32 %v677_v56 }
 0x241   : > { %v1822_v57 = vpop.eup %1821 }
 0x242   : > { %v679_v58 = vadd.f32 1.0, %v1822_v57 }
 0x244   : > { %1823 = vrcp.f32 %v679_v58 }
 0x251   : > { %v1824_v59 = vpop.eup %1823 }
 0x252   : > { %v681_v60 = vmul.f32 %v1824_v59, %v675_v54 }
 0x254   : > { %682 = vst.msk [vmem:[#allocation3] sm:$0xff] %vm534_vm2, %v681_v60  ;;  %v686_v61 = vpack.c.bf16 %v681_v60, %v681_v60 }
 0x256   : > { %1681 = vmatmul.mubr.msk.bf16.vlgmr.msra.gmra.mxu1 %vm534_vm2, %v686_v61 }
 0x28f   : > { %v635_v62 = vpop.permute.xlu0 %634 }
 0x290   : > { %638 = vst.msk [vmem:[#allocation4] sm:$0xff] %vm534_vm2, %v635_v62 }
 0x316   : > { %v756_v1 = vpop.f32.mrf.mxu1 }
 0x317   : > { %v772_v3 = vpack.c.bf16 %v756_v1, %v756_v1  ;;  %763 = vrot.lane.b32.xlu1 %v756_v1, %s1976_s28  ;;  %s2446_s28 = sand.u32 1, %s1955_s30  }
 0x318   : > { %v1682_v4 = vpop.f32.mrf.mxu1  ;;  %s2545_s20 = sshll.u32 %s2446_s28, 3  ;;  %s1468_s27 = scalar_lea.sflag [#allocation13], %s2446_s28 }
 0x319   : > { %1687 = vmatmul.mubr.msk.bf16.vlgmr.msra.gmra.mxu0 %vm781_vm5, %v772_v3  ;;  %s514_s24 = scalar_lea.vmem [#allocation12], %s2545_s20  ;;  %s1871_s20 = scalar_lea.vmem %s1870_s2, 256 }
 0x31a   : > { %v759_v5 = vpop.f32.mrf.mxu1  ;;  %1698 = vmatprep.mubr.msk.bf16.mxu0 %vm1974_vm1, %v1973_v10  ;;  %542 = vst.msk [vmem:[%s514_s24] sm:$0xff] %vm541_vm0, %v2127_v2  ;;  %s1496_s22 = sshll.u32 %s514_s24, 4  ;;  %s1497_s22 = int_to_ptr.vmem [resolvable:$true] %s1496_s22 }
 0x31b   : > { %768 = vrot.lane.b32.xlu1 %v756_v1, %s1977_s19  ;;  %s2546_s19 = sshll.u32 %s1963_s16, 7  ;;  %s1865_s0 = scalar_lea.vmem %s1497_s22, 128 }
 0x31c   : > { %v1683_v6 = vpop.f32.mrf.mxu1  ;;  %s1494_s17 = scalar_lea.hbm %s2541_s14, %s2546_s19  ;;  %p1866_p12 = scmp.ne.s32.totalorder %s1497_s22, %s1865_s0 }
 0x31d   : > { %p1872_p1 = scmp.lt.s32.totalorder %s1497_s22, %s1870_s2  ;;  %p1873_p2 = scmp.lt.s32.totalorder %s1871_s20, %s1865_s0 }
 0x31e   : > { %p1867_p13 = pnand %p1866_p12, %p2104_p4 }
 0x31f   : > { %p1874_p3 = por %p1873_p2, %p1872_p1 }
 0x320   : > { %p1868_p0 = pneg %p1867_p13 }
 0x322   : > { %p1875_p5 = pnand %p1874_p3, %p1868_p0 }
 0x389   : > { %v764_v7 = vpop.permute.xlu1 %763 }
 0x38a   : > { %767 = vst.msk [vmem:[#allocation6] sm:$0xff] %vm766_vm6, %v764_v7 }
 0x38d   : > { %v769_v8 = vpop.permute.xlu1 %768 }
 0x38e   : > { %771 = vst.msk [vmem:[#allocation7] sm:$0xff] %vm766_vm6, %v769_v8 }
 0x391   : > { %v843_v9 = vld [vmem:[#allocation6] sm:$0xff] }
 0x392   : > { %844 = vxpose.xlu0.b32.start.end [1/1] (short) (narrow) %v843_v9, 16 }
 0x395   : > { %v876_v11 = vld [vmem:[#allocation7] sm:$0xff] }
 0x396   : > { %877 = vxpose.xlu1.b32.start.end [1/1] (short) (narrow) %v876_v11, 16  ;;  %v2264_v11 = vld [vmem:[#allocation3] sm:$0xff] }
 0x3b4   : > { %1776 = vset.pattern.permute.xlu1 %v1978_v12 }
 0x3bb   : > { %1779 = vset.pattern.permute.xlu0 %v1979_v13 }
 0x3d9   : > { %v823_v15 = vpop.f32.mrf.mxu0 }
 0x3da   : > { %v824_v16 = vadd.f32 %v1635_v14, %v823_v15 }
 0x3db   : > { %v1688_v17 = vpop.f32.mrf.mxu0 }
 0x3dc   : > { %v830_v18 = vand.u32 2147483647, %v824_v16  ;;  %v829_v26 = vmax.f32 %v824_v16, 0.0  ;;  %v1815_v16 = vld [vmem:[%s2539_s12 + $0x18] sm:$0xff]  }
 0x3dd   : > { %v826_v19 = vpop.f32.mrf.mxu0  ;;  %1691 = vmatpush3.bf16.msra.mxu0 %v1815_v16  ;;  %v2350_v16 = vld [vmem:[%s2537_s10 + $0x8] sm:$0xff] }
 0x3de   : > { %v831_v20 = vsub.f32 0.0, %v830_v18  ;;  %v1048_v19 = vld [vmem:[#allocation9] sm:$0xff]  ;;  %1692 = vmatprep.subr.bf16.mxu0 %v1973_v10 }
 0x3df   : > { %v1689_v21 = vpop.f32.mrf.mxu0 }
 0x3e0   : > { %v832_v22 = vmul.f32 1.442695, %v831_v20  ;;  %v1816_v20 = vld [vmem:[%s2539_s12 + $0x10] sm:$0xff]  }
 0x3e1   : > { %1693 = vmatpush3.bf16.msra.mxu0 %v1816_v20  ;;  %v1317_v20 = vsub.s32 7, %v2177_v27 }
 0x3e2   : > { %1825 = vpow2.f32 %v832_v22  ;;  %1694 = vmatprep.subr.bf16.mxu0 %v1973_v10 }
 0x3ef   : > { %v1826_v23 = vpop.eup %1825 }
 0x3f0   : > { %v834_v24 = vadd.f32 1.0, %v1826_v23 }
 0x3f2   : > { %1827 = vlog2.f32 %v834_v24 }
 0x3ff   : > { %v1828_v25 = vpop.eup %1827 }
 0x400   : > { %v836_v28 = vmul.f32 0.6931472, %v1828_v25 }
 0x402   : > { %v837_v31 = vadd.f32 %v836_v28, %v829_v26 }
 0x404   : > { %838 = vst.msk [vmem:[#allocation5] sm:$0xff] %vm534_vm2, %v837_v31 }
 0x40b   : > { %v841_v48 = vld [vmem:[#allocation5] sm:$0xff] }
 0x40c   : > { %v917_v49 = vrot.slane %v841_v48, %v916_v47  ;;  %v910_v58 = vcombine.high %v841_v48, %v841_v48 }
 0x40e   : > { %v860_v32 = vpop.trf.xlu0  ;;  %v933_v50 = vrot.slane %v917_v49, %v916_v47  ;;  %v925_v51 = vcombine.high %v917_v49, %v917_v49  ;;  %v924_v62 = vrot.slane %v910_v58, %v916_v47 }
 0x40f   : > { %1172 = vperm.xlu0 %1779, %v860_v32   ;;  %1058 = vperm.xlu1 %1776, %v860_v32  }
 0x410   : > { %v2235_v52 = vrot.slane %v933_v50, %v2181_v29  ;;  %v947_v54 = vrot.slane %v925_v51, %v916_v47  ;;  %v955_v57 = vcombine.high %v933_v50, %v933_v50  ;;  %v940_v3 = vrot.slane %v924_v62, %v916_v47 }
 0x411   : > { %v926_v4 = vcombine.high %v924_v62, %v924_v62 }
 0x412   : > { %v2215_v34 = vpop.trf.xlu1  ;;  %v861_v41 = vpop.trf.xlu0  ;;  %v999_v55 = vmul.f32 %v2235_v52, %v2240_v53  ;;  %v2245_v56 = vrot.slane %v947_v54, %v2181_v29  ;;  %v2252_v61 = vrot.slane %v955_v57, %v2181_v29  ;;  %v957_v63 = vcombine.high %v947_v54, %v947_v54 }
 0x413   : > { %1784 = vset.pattern.permute.xlu0 %v1980_v35  ;;  %1777 = vset.pattern.permute.xlu1 %v1980_v35  ;;  %v2260_v7 = vrot.slane %v940_v3, %v2181_v29  ;;  %v954_v8 = vrot.slane %v926_v4, %v916_v47  ;;  %v956_v15 = vcombine.high %v940_v3, %v940_v3  ;;  %v1243_v3 = vsub.s32 5, %v2177_v27 }
 0x414   : > { %1098 = vperm.xlu1 %1777, %v860_v32   ;;  %1110 = vperm.xlu0 %1784, %v2215_v34   ;;  %v1015_v59 = vmul.f32 1.442695, %v999_v55  ;;  %v1001_v60 = vmul.f32 %v2245_v56, %v2240_v53  ;;  %v1003_v1 = vmul.f32 %v2252_v61, %v2240_v53  ;;  %v2257_v5 = vrot.slane %v957_v63, %v2181_v29 }
 0x415   : > { %v2272_v14 = vrot.slane %v954_v8, %v2181_v29  ;;  %v2288_v25 = vrot.slane %v956_v15, %v2181_v29  ;;  %v958_v31 = vcombine.high %v954_v8, %v954_v8  ;;  %v1206_v55 = vsub.s32 4, %v2177_v27 }
 0x416   : > { %v894_v43 = vpop.trf.xlu1  ;;  %1829 = vpow2.f32 %v1015_v59  ;;  %v1019_v0 = vmul.f32 1.442695, %v1001_v60  ;;  %v1023_v6 = vmul.f32 1.442695, %v1003_v1  ;;  %v1005_v9 = vmul.f32 %v2257_v5, %v2240_v53 }
 0x417   : > { %v1009_v24 = vmul.f32 %v2272_v14, %v2240_v53  ;;  %v1280_v8 = vsub.s32 6, %v2177_v27 }
 0x418   : > { %1778 = vset.pattern.permute.xlu1 %v1981_v36  ;;  %1787 = vset.pattern.permute.xlu0 %v1982_v38  ;;  %1831 = vpow2.f32 %v1019_v0  ;;  %v1027_v17 = vmul.f32 1.442695, %v1005_v9 }
 0x419   : > { %1135 = vperm.xlu1 %1778, %v860_v32   ;;  %1320 = vperm.xlu0 %1787, %v860_v32   ;;  %1833 = vpow2.f32 %v1023_v6 }
 0x41a   : > { %1835 = vpow2.f32 %v1027_v17 }
 0x41d   : > { %1780 = vset.pattern.permute.xlu1 %v1983_v39  ;;  %1790 = vset.pattern.permute.xlu0 %v1984_v40 }
 0x41e   : > { %1209 = vperm.xlu1 %1780, %v860_v32   ;;  %1295 = vperm.xlu0 %1790, %v2215_v34  }
 0x422   : > { %1781 = vset.pattern.permute.xlu1 %v1985_v42  ;;  %1791 = vset.pattern.permute.xlu0 %v1978_v12 }
 0x423   : > { %1246 = vperm.xlu1 %1781, %v860_v32   ;;  %1063 = vperm.xlu0 %1791, %v861_v41   ;;  %v1830_v18 = vpop.eup %1829 }
 0x424   : > { %v1050_v26 = vmul.f32 %v1830_v18, %v1048_v19 }
 0x427   : > { %1782 = vset.pattern.permute.xlu1 %v1984_v40  ;;  %1795 = vset.pattern.permute.xlu0 %v1983_v39 }
 0x428   : > { %1283 = vperm.xlu1 %1782, %v860_v32   ;;  %1213 = vperm.xlu0 %1795, %v861_v41   ;;  %v1817_v32 = vld [vmem:[%s2539_s12 + $0x8] sm:$0xff]  }
 0x429   : > { %1695 = vmatpush3.bf16.msra.mxu0 %v1817_v32 }
 0x42a   : > { %1696 = vmatprep.subr.bf16.mxu0 %v1973_v10 }
 0x42c   : > { %1783 = vset.pattern.permute.xlu1 %v1978_v12  ;;  %1797 = vset.pattern.permute.xlu0 %v1984_v40 }
 0x42d   : > { %1287 = vperm.xlu0 %1797, %v861_v41   ;;  %1072 = vperm.xlu1 %1783, %v2215_v34  }
 0x431   : > { %1785 = vset.pattern.permute.xlu1 %v1981_v36  ;;  %1800 = vset.pattern.permute.xlu0 %v1981_v36 }
 0x432   : > { %1147 = vperm.xlu1 %1785, %v2215_v34   ;;  %1151 = vperm.xlu0 %1800, %v894_v43  }
 0x436   : > { %1786 = vset.pattern.permute.xlu1 %v1979_v13  ;;  %1803 = vset.pattern.permute.xlu0 %v1983_v39 }
 0x437   : > { %1184 = vperm.xlu1 %1786, %v2215_v34   ;;  %1225 = vperm.xlu0 %1803, %v894_v43  }
 0x43b   : > { %1788 = vset.pattern.permute.xlu1 %v1983_v39  ;;  %1807 = vset.pattern.permute.xlu0 %v1982_v38 }
 0x43c   : > { %1221 = vperm.xlu1 %1788, %v2215_v34   ;;  %1336 = vperm.xlu0 %1807, %v894_v43  }
 0x440   : > { %1789 = vset.pattern.permute.xlu1 %v1985_v42 }
 0x441   : > { %1258 = vperm.xlu1 %1789, %v2215_v34  }
 0x445   : > { %1792 = vset.pattern.permute.xlu1 %v1980_v35 }
 0x446   : > { %1102 = vperm.xlu1 %1792, %v861_v41  }
 0x44a   : > { %1793 = vset.pattern.permute.xlu1 %v1981_v36 }
 0x44b   : > { %1139 = vperm.xlu1 %1793, %v861_v41  }
 0x44f   : > { %1794 = vset.pattern.permute.xlu1 %v1979_v13 }
 0x450   : > { %1176 = vperm.xlu1 %1794, %v861_v41  }
 0x454   : > { %1796 = vset.pattern.permute.xlu1 %v1985_v42 }
 0x455   : > { %1250 = vperm.xlu1 %1796, %v861_v41  }
 0x459   : > { %1798 = vset.pattern.permute.xlu1 %v1978_v12  ;;  %v2267_v12 = vmul.f32 %v2264_v11, %v841_v48 }
 0x45a   : > { %1077 = vperm.xlu1 %1798, %v894_v43  }
 0x45b   : > { %v2282_v21 = vrot.slane %v2267_v12, %v2181_v29  ;;  %v2300_v36 = vrot.slane %v2267_v12, %v650_v30  ;;  %v1818_v30 = vld [vmem:[%s2539_s12] sm:$0xff]   ;;  %v2316_v48 = vrot.slane %v2267_v12, %v657_v33  ;;  %v2327_v57 = vrot.slane %v2267_v12, %v664_v37 }
 0x45c   : > { %1697 = vmatpush3.bf16.msra.mxu0 %v1818_v30  ;;  %v2336_v1 = vrot.slane %v2267_v12, %v1206_v55  ;;  %v2355_v19 = vrot.slane %v2267_v12, %v1280_v8 }
 0x45e   : > { %1799 = vset.pattern.permute.xlu1 %v1980_v35  ;;  %v1832_v35 = vpop.eup %1831 }
 0x45f   : > { %1114 = vperm.xlu1 %1799, %v894_v43   ;;  %v1834_v46 = vpop.eup %1833 }
 0x460   : > { %v1836_v59 = vpop.eup %1835 }
 0x463   : > { %1801 = vset.pattern.permute.xlu1 %v1979_v13  ;;  %v1007_v13 = vmul.f32 %v2260_v7, %v2240_v53 }
 0x464   : > { %1188 = vperm.xlu1 %1801, %v894_v43  }
 0x465   : > { %v1031_v23 = vmul.f32 1.442695, %v1007_v13  ;;  %v2345_v13 = vrot.slane %v2267_v12, %v1243_v3 }
 0x467   : > { %1837 = vpow2.f32 %v1031_v23 }
 0x468   : > { %1802 = vset.pattern.permute.xlu1 %v1982_v38 }
 0x469   : > { %1324 = vperm.xlu1 %1802, %v861_v41   ;;  %v1035_v41 = vmul.f32 1.442695, %v1009_v24 }
 0x46b   : > { %1839 = vpow2.f32 %v1035_v41 }
 0x46d   : > { %1804 = vset.pattern.permute.xlu1 %v1985_v42  ;;  %v1011_v42 = vmul.f32 %v2288_v25, %v2240_v53 }
 0x46e   : > { %1262 = vperm.xlu1 %1804, %v894_v43  }
 0x472   : > { %1805 = vset.pattern.permute.xlu1 %v1984_v40 }
 0x473   : > { %1299 = vperm.xlu1 %1805, %v894_v43   ;;  %v2306_v43 = vrot.slane %v958_v31, %v2181_v29  ;;  %v1039_v29 = vmul.f32 1.442695, %v1011_v42 }
 0x474   : > { %v1838_v63 = vpop.eup %1837 }
 0x475   : > { %v1013_v49 = vmul.f32 %v2306_v43, %v2240_v53  ;;  %1841 = vpow2.f32 %v1039_v29 }
 0x477   : > { %1806 = vset.pattern.permute.xlu1 %v1982_v38  ;;  %v1043_v58 = vmul.f32 1.442695, %v1013_v49  ;;  %v1006_v49 = vmul.f32 %v2257_v5, %v2350_v16  ;;  %v1010_v5 = vmul.f32 %v2272_v14, %v2350_v16 }
 0x478   : > { %1332 = vperm.xlu1 %1806, %v2215_v34   ;;  %v1840_v15 = vpop.eup %1839 }
 0x479   : > { %1843 = vpow2.f32 %v1043_v58  ;;  %v1029_v55 = vmul.f32 1.442695, %v1006_v49 }
 0x482   : > { %v1842_v24 = vpop.eup %1841 }
 0x48a   : > { %v1059_v22 = vpop.permute.xlu1 %1058  ;;  %v1173_v38 = vpop.permute.xlu0 %1172 }
 0x48b   : > { %v1066_v28 = vmul.f32 %v1059_v22, %v2282_v21  ;;  %v1179_v53 = vmul.f32 %v1173_v38, %v2327_v57 }
 0x48d   : > { %v2294_v34 = vadd.f32 %v1066_v28, %v1050_v26  ;;  %v1000_v26 = vmul.f32 %v2235_v52, %v2350_v16  ;;  %v1002_v52 = vmul.f32 %v2245_v56, %v2350_v16 }
 0x48f   : > { %v1099_v39 = vpop.permute.xlu1 %1098  ;;  %v1091_v40 = vmul.f32 %v1832_v35, %v2294_v34  ;;  %v1111_v47 = vpop.permute.xlu0 %1110  ;;  %v2365_v35 = vrot.slane %v2267_v12, %v1317_v20  ;;  %v1021_v12 = vmul.f32 1.442695, %v1002_v52 }
 0x490   : > { %v1105_v44 = vmul.f32 %v1099_v39, %v2300_v36  ;;  %v1844_v39 = vpop.eup %1843 }
 0x492   : > { %v1107_v45 = vadd.f32 %v1105_v44, %v1091_v40  ;;  %v1017_v40 = vmul.f32 1.442695, %v1000_v26 }
 0x494   : > { %v2320_v50 = vmul.f32 %v1111_v47, %v1107_v45  ;;  %v1136_v51 = vpop.permute.xlu1 %1135  ;;  %v1128_v54 = vmul.f32 %v1834_v46, %v1107_v45  ;;  %v1321_v32 = vpop.permute.xlu0 %1320  ;;  %1845 = vpow2.f32 %v1017_v40  ;;  %v1004_v45 = vmul.f32 %v2252_v61, %v2350_v16 }
 0x495   : > { %v1142_v10 = vmul.f32 %v1136_v51, %v2316_v48  ;;  %v1327_v41 = vmul.f32 %v1321_v32, %v2365_v35  ;;  %1847 = vpow2.f32 %v1021_v12  ;;  %v1008_v61 = vmul.f32 %v2260_v7, %v2350_v16 }
 0x496   : > { %v1025_v29 = vmul.f32 1.442695, %v1004_v45 }
 0x497   : > { %v2329_v33 = vadd.f32 %v1142_v10, %v1128_v54  ;;  %v1049_v10 = vld [vmem:[#allocation9 + $0x8] sm:$0xff] }
 0x498   : > { %1849 = vpow2.f32 %v1025_v29 }
 0x499   : > { %v1165_v60 = vmul.f32 %v1836_v59, %v2329_v33  ;;  %v1210_v62 = vpop.permute.xlu1 %1209  ;;  %v2381_v46 = vpop.permute.xlu0 %1295  ;;  %1851 = vpow2.f32 %v1029_v55 }
 0x49a   : > { %v1216_v4 = vmul.f32 %v1210_v62, %v2336_v1  ;;  %v1033_v62 = vmul.f32 1.442695, %v1008_v61 }
 0x49b   : > { %v2333_v0 = vadd.f32 %v1179_v53, %v1165_v60 }
 0x49c   : > { %1853 = vpow2.f32 %v1033_v62 }
 0x49d   : > { %v1202_v37 = vmul.f32 %v1838_v63, %v2333_v0 }
 0x49e   : > { %v1247_v6 = vpop.permute.xlu1 %1246  ;;  %v1064_v51 = vpop.permute.xlu0 %1063 }
 0x49f   : > { %v2342_v9 = vadd.f32 %v1216_v4, %v1202_v37  ;;  %v1253_v18 = vmul.f32 %v1247_v6, %v2345_v13  ;;  %v1067_v58 = vmul.f32 %v1064_v51, %v2282_v21  ;;  %v1037_v21 = vmul.f32 1.442695, %v1010_v5 }
 0x4a1   : > { %v1239_v17 = vmul.f32 %v1840_v15, %v2342_v9  ;;  %v1846_v56 = vpop.eup %1845  ;;  %1855 = vpow2.f32 %v1037_v21 }
 0x4a2   : > { %v1051_v59 = vmul.f32 %v1846_v56, %v1049_v10  ;;  %v1848_v3 = vpop.eup %1847 }
 0x4a3   : > { %v2358_v22 = vadd.f32 %v1253_v18, %v1239_v17  ;;  %v1284_v23 = vpop.permute.xlu1 %1283  ;;  %v1214_v63 = vpop.permute.xlu0 %1213 }
 0x4a4   : > { %v1290_v28 = vmul.f32 %v1284_v23, %v2355_v19  ;;  %v1069_v60 = vadd.f32 %v1067_v58, %v1051_v59  ;;  %v1012_v23 = vmul.f32 %v2288_v25, %v2350_v16  ;;  %v1217_v25 = vmul.f32 %v1214_v63, %v2336_v1 }
 0x4a5   : > { %v1276_v31 = vmul.f32 %v1842_v24, %v2358_v22  ;;  %v1850_v15 = vpop.eup %1849 }
 0x4a6   : > { %v1092_v4 = vmul.f32 %v1848_v3, %v1069_v60  ;;  %v1852_v26 = vpop.eup %1851  ;;  %v1041_v32 = vmul.f32 1.442695, %v1012_v23  ;;  %v2418_v23 = vld [vmem:[#allocation4] sm:$0xff] }
 0x4a7   : > { %v2367_v38 = vadd.f32 %v1290_v28, %v1276_v31 }
 0x4a8   : > { %v2369_v27 = vpop.permute.xlu1 %1072  ;;  %v1288_v7 = vpop.permute.xlu0 %1287  ;;  %1857 = vpow2.f32 %v1041_v32 }
 0x4a9   : > { %v1313_v42 = vmul.f32 %v1844_v39, %v2367_v38  ;;  %v1080_v10 = vmul.f32 %v2369_v27, %v2294_v34 }
 0x4ab   : > { %v2373_v44 = vadd.f32 %v1327_v41, %v1313_v42  ;;  %v1854_v42 = vpop.eup %1853 }
 0x4ad   : > { %v1148_v30 = vpop.permute.xlu1 %1147  ;;  %1350 = vst.msk [vmem:[#allocation9] sm:$0xff] %vm534_vm2, %v2373_v44  ;;  %v1152_v24 = vpop.permute.xlu0 %1151 }
 0x4ae   : > { %v1154_v40 = vmul.f32 %v1148_v30, %v2329_v33  ;;  %v1856_v30 = vpop.eup %1855 }
 0x4b0   : > { %v1156_v29 = vsel %vm534_vm2, %v1154_v40, 0.0 }
 0x4b2   : > { %v2383_v47 = vpop.permute.xlu1 %1184  ;;  %v1226_v56 = vpop.permute.xlu0 %1225 }
 0x4b7   : > { %v1222_v54 = vpop.permute.xlu1 %1221 }
 0x4b8   : > { %v1228_v51 = vmul.f32 %v1222_v54, %v2342_v9  ;;  %v1082_v9 = vsel %vm534_vm2, %v1080_v10, 0.0 }
 0x4ba   : > { %v1230_v61 = vsel %vm534_vm2, %v1228_v51, 0.0 }
 0x4bc   : > { %v2390_v53 = vpop.permute.xlu1 %1258 }
 0x4c1   : > { %v1103_v37 = vpop.permute.xlu1 %1102 }
 0x4c2   : > { %v1106_v6 = vmul.f32 %v1103_v37, %v2300_v36 }
 0x4c4   : > { %v1108_v8 = vadd.f32 %v1106_v6, %v1092_v4  ;;  %v1858_v6 = vpop.eup %1857 }
 0x4c6   : > { %v1140_v17 = vpop.permute.xlu1 %1139  ;;  %v1129_v18 = vmul.f32 %v1850_v15, %v1108_v8 }
 0x4c7   : > { %v1143_v20 = vmul.f32 %v1140_v17, %v2316_v48  ;;  %v1014_v48 = vmul.f32 %v2306_v43, %v2350_v16 }
 0x4c9   : > { %v1145_v14 = vadd.f32 %v1143_v20, %v1129_v18  ;;  %v1045_v33 = vmul.f32 1.442695, %v1014_v48  ;;  %v1191_v18 = vmul.f32 %v2383_v47, %v2333_v0 }
 0x4cb   : > { %v1177_v28 = vpop.permute.xlu1 %1176  ;;  %v1166_v31 = vmul.f32 %v1852_v26, %v1145_v14  ;;  %v1155_v36 = vmul.f32 %v1152_v24, %v1145_v14  ;;  %1859 = vpow2.f32 %v1045_v33  ;;  %v1291_v24 = vmul.f32 %v1288_v7, %v2355_v19 }
 0x4cc   : > { %v1180_v39 = vmul.f32 %v1177_v28, %v2327_v57 }
 0x4cd   : > { %v1157_v52 = vsel %vm534_vm2, %v1155_v36, 0.0 }
 0x4ce   : > { %v1182_v41 = vadd.f32 %v1180_v39, %v1166_v31  ;;  %v1158_v57 = vadd.f32 %v1157_v52, %v1156_v29  ;;  %v1193_v39 = vsel %vm534_vm2, %v1191_v18, 0.0 }
 0x4d0   : > { %v1203_v12 = vmul.f32 %v1854_v42, %v1182_v41  ;;  %v1251_v45 = vpop.permute.xlu1 %1250  ;;  %v1159_v59 = vrot.slane %v1158_v57, 4 }
 0x4d1   : > { %v1254_v62 = vmul.f32 %v1251_v45, %v2345_v13 }
 0x4d2   : > { %v1219_v49 = vadd.f32 %v1217_v25, %v1203_v12  ;;  %v1160_v27 = vadd.f32 %v1159_v59, %v1158_v57 }
 0x4d4   : > { %v1229_v55 = vmul.f32 %v1226_v56, %v1219_v49  ;;  %v1240_v43 = vmul.f32 %v1856_v30, %v1219_v49  ;;  %v1161_v14 = vrot.slane %v1160_v27, 2  ;;  %v1265_v30 = vmul.f32 %v2390_v53, %v2358_v22 }
 0x4d5   : > { %v1078_v16 = vpop.permute.xlu1 %1077  ;;  %v1302_v53 = vmul.f32 %v2381_v46, %v2367_v38 }
 0x4d6   : > { %v1231_v1 = vsel %vm534_vm2, %v1229_v55, 0.0  ;;  %v1081_v58 = vmul.f32 %v1078_v16, %v1069_v60  ;;  %v1256_v5 = vadd.f32 %v1254_v62, %v1240_v43  ;;  %v1119_v60 = vsel %vm534_vm2, %v2320_v50, 0.0 }
 0x4d7   : > { %v1232_v54 = vadd.f32 %v1231_v1, %v1230_v61  ;;  %v1378_v50 = vsub.f32 0.0, %v2418_v23  ;;  %v1162_v47 = vadd.f32 %v1161_v14, %v1160_v27  ;;  %v1267_v62 = vsel %vm534_vm2, %v1265_v30, 0.0 }
 0x4d8   : > { %v1083_v63 = vsel %vm534_vm2, %v1081_v58, 0.0  ;;  %v1277_v15 = vmul.f32 %v1858_v6, %v1256_v5  ;;  %v1860_v25 = vpop.eup %1859 }
 0x4d9   : > { %v1084_v3 = vadd.f32 %v1083_v63, %v1082_v9  ;;  %v1233_v21 = vrot.slane %v1232_v54, 4  ;;  %v1163_v57 = vrot.slane %v1162_v47, 1 }
 0x4da   : > { %v1115_v34 = vpop.permute.xlu1 %1114  ;;  %v1293_v36 = vadd.f32 %v1291_v24, %v1277_v15 }
 0x4db   : > { %v1085_v37 = vrot.slane %v1084_v3, 4  ;;  %v1118_v4 = vmul.f32 %v1115_v34, %v1108_v8  ;;  %v1234_v28 = vadd.f32 %v1233_v21, %v1232_v54  ;;  %v1164_v61 = vadd.f32 %v1163_v57, %v1162_v47  ;;  %v1337_v21 = vpop.permute.xlu0 %1336 }
 0x4dc   : > { %v1314_v45 = vmul.f32 %v1860_v25, %v1293_v36 }
 0x4dd   : > { %v1086_v17 = vadd.f32 %v1085_v37, %v1084_v3  ;;  %v1120_v13 = vsel %vm534_vm2, %v1118_v4, 0.0  ;;  %v1235_v52 = vrot.slane %v1234_v28, 2 }
 0x4de   : > { %v1121_v20 = vadd.f32 %v1120_v13, %v1119_v60 }
 0x4df   : > { %v1087_v26 = vrot.slane %v1086_v17, 2  ;;  %v1189_v8 = vpop.permute.xlu1 %1188  ;;  %v1236_v10 = vadd.f32 %v1235_v52, %v1234_v28 }
 0x4e0   : > { %v1122_v31 = vrot.slane %v1121_v20, 4  ;;  %v1192_v32 = vmul.f32 %v1189_v8, %v1182_v41  ;;  %v1379_v41 = vmul.f32 1.442695, %v1378_v50 }
 0x4e1   : > { %v1088_v40 = vadd.f32 %v1087_v26, %v1086_v17  ;;  %v1237_v9 = vrot.slane %v1236_v10, 1  ;;  %v1304_v17 = vsel %vm534_vm2, %v1302_v53, 0.0 }
 0x4e2   : > { %v1123_v42 = vadd.f32 %v1122_v31, %v1121_v20  ;;  %v1194_v0 = vsel %vm534_vm2, %v1192_v32, 0.0  ;;  %1861 = vpow2.f32 %v1379_v41 }
 0x4e3   : > { %v1195_v48 = vadd.f32 %v1194_v0, %v1193_v39  ;;  %v1089_v49 = vrot.slane %v1088_v40, 1  ;;  %v1238_v6 = vadd.f32 %v1237_v9, %v1236_v10 }
 0x4e4   : > { %v1124_v19 = vrot.slane %v1123_v42, 2  ;;  %v1325_v7 = vpop.permute.xlu1 %1324 }
 0x4e5   : > { %v1196_v12 = vrot.slane %v1195_v48, 4  ;;  %v1328_v29 = vmul.f32 %v1325_v7, %v2365_v35  ;;  %v1090_v1 = vadd.f32 %v1089_v49, %v1088_v40 }
 0x4e6   : > { %v1125_v51 = vadd.f32 %v1124_v19, %v1123_v42 }
 0x4e7   : > { %v1197_v56 = vadd.f32 %v1196_v12, %v1195_v48  ;;  %v1330_v33 = vadd.f32 %v1328_v29, %v1314_v45 }
 0x4e8   : > { %v1126_v55 = vrot.slane %v1125_v51, 1 }
 0x4e9   : > { %v1198_v43 = vrot.slane %v1197_v56, 2  ;;  %1351 = vst.msk [vmem:[#allocation9 + $0x8] sm:$0xff] %vm534_vm2, %v1330_v33  ;;  %v1263_v16 = vpop.permute.xlu1 %1262  ;;  %v1340_v18 = vmul.f32 %v1337_v21, %v1330_v33 }
 0x4ea   : > { %v1127_v58 = vadd.f32 %v1126_v55, %v1125_v51  ;;  %v1266_v35 = vmul.f32 %v1263_v16, %v1256_v5  ;;  %v1637_v51 = vld [vmem:[%s2538_s11] ss:$0 sm:$0xff] }
 0x4eb   : > { %v1199_v59 = vadd.f32 %v1198_v43, %v1197_v56  ;;  %v1376_v56 = vmul.f32 %v1637_v51, %v2264_v11 }
 0x4ec   : > { %v1352_v54 = vsel %vm785_vm4, %v1090_v1, %v1127_v58  ;;  %v1268_v22 = vsel %vm534_vm2, %v1266_v35, 0.0 }
 0x4ed   : > { %v1200_v63 = vrot.slane %v1199_v59, 1  ;;  %v1354_v3 = vsel %vm1353_vm7, %v1352_v54, %v1164_v61  ;;  %v1269_v34 = vadd.f32 %v1268_v22, %v1267_v62 }
 0x4ee   : > { %v1300_v27 = vpop.permute.xlu1 %1299 }
 0x4ef   : > { %v1201_v37 = vadd.f32 %v1200_v63, %v1199_v59  ;;  %v1270_v5 = vrot.slane %v1269_v34, 4  ;;  %v1303_v4 = vmul.f32 %v1300_v27, %v1293_v36  ;;  %v1862_v28 = vpop.eup %1861  ;;  %v1342_v36 = vsel %vm534_vm2, %v1340_v18, 0.0 }
 0x4f0   : > { %v1381_v48 = vadd.f32 1.0, %v1862_v28 }
 0x4f1   : > { %v1356_v60 = vsel %vm1355_vm8, %v1354_v3, %v1201_v37  ;;  %v1271_v15 = vadd.f32 %v1270_v5, %v1269_v34  ;;  %v1305_v13 = vsel %vm534_vm2, %v1303_v4, 0.0 }
 0x4f2   : > { %v1358_v20 = vsel %vm1357_vm9, %v1356_v60, %v1238_v6  ;;  %v1306_v38 = vadd.f32 %v1305_v13, %v1304_v17  ;;  %1863 = vrcp.f32 %v1381_v48 }
 0x4f3   : > { %v1272_v46 = vrot.slane %v1271_v15, 2  ;;  %v1333_v24 = vpop.permute.xlu1 %1332 }
 0x4f4   : > { %v1307_v14 = vrot.slane %v1306_v38, 4  ;;  %v1339_v26 = vmul.f32 %v1333_v24, %v2373_v44 }
 0x4f5   : > { %v1273_v8 = vadd.f32 %v1272_v46, %v1271_v15 }
 0x4f6   : > { %v1308_v31 = vadd.f32 %v1307_v14, %v1306_v38  ;;  %v1341_v32 = vsel %vm534_vm2, %v1339_v26, 0.0 }
 0x4f7   : > { %v1274_v50 = vrot.slane %v1273_v8, 1  ;;  %v1343_v39 = vadd.f32 %v1342_v36, %v1341_v32 }
 0x4f8   : > { %v1309_v40 = vrot.slane %v1308_v31, 2 }
 0x4f9   : > { %v1275_v42 = vadd.f32 %v1274_v50, %v1273_v8  ;;  %v1344_v0 = vrot.slane %v1343_v39, 4 }
 0x4fa   : > { %v1310_v47 = vadd.f32 %v1309_v40, %v1308_v31 }
 0x4fb   : > { %v1360_v25 = vsel %vm1359_vm10, %v1358_v20, %v1275_v42  ;;  %v1345_v52 = vadd.f32 %v1344_v0, %v1343_v39 }
 0x4fc   : > { %v1311_v19 = vrot.slane %v1310_v47, 1 }
 0x4fd   : > { %v1346_v44 = vrot.slane %v1345_v52, 2 }
 0x4fe   : > { %v1312_v7 = vadd.f32 %v1311_v19, %v1310_v47 }
 0x4ff   : > { %v1347_v12 = vadd.f32 %v1346_v44, %v1345_v52  ;;  %v1864_v57 = vpop.eup %1863 }
 0x500   : > { %v1362_v45 = vsel %vm1361_vm11, %v1360_v25, %v1312_v7  ;;  %v1383_v10 = vmul.f32 %v1864_v57, %v2418_v23 }
 0x501   : > { %v1348_v29 = vrot.slane %v1347_v12, 1 }
 0x503   : > { %v1349_v41 = vadd.f32 %v1348_v29, %v1347_v12 }
 0x505   : > { %v1364_v49 = vsel %vm1363_vm12, %v1362_v45, %v1349_v41 }
 0x506   : > { %1365 = vst.msk [vmem:[#allocation8] sm:$0xff] %vm534_vm2, %v1364_v49 }
 0x50d   : > { %v1367_v33 = vld [vmem:[#allocation8] sm:$0xff] }
 0x50e   : > { %v1377_v30 = vadd.f32 %v1376_v56, %v1367_v33 }
 0x510   : > { %v1384_v55 = vmul.f32 %v1383_v10, %v1377_v30 }
 0x512   : > { %v1385_v43 = vpack.c.bf16 %v1384_v55, %v1384_v55 }
 0x514   : > { %1699 = vmatmul.mubr.msk.bf16.vlgmr.msra.gmra.mxu0 %vm534_vm2, %v1385_v43 }
 0x515   : > { %1878 = shalt.err (!%p1875_p5)
}
 0x516   : > { %s1879_s3 = scalar_lea.hbm %s1494_s17, 128  ;;  %s1883_s21 = scalar_lea.hbm %s2541_s14, 256 }
 0x517   : > { %p1880_p6 = scmp.ne.s32.totalorder %s1494_s17, %s1879_s3  ;;  %p1884_p10 = scmp.lt.s32.totalorder %s1494_s17, %s2541_s14 }
 0x518   : > { %p1885_p11 = scmp.lt.s32.totalorder %s1883_s21, %s1879_s3 }
 0x519   : > { %p1881_p7 = pnand %p1880_p6, %p2104_p4 }
 0x51a   : > { %p1886_p12 = por %p1885_p11, %p1884_p10 }
 0x51b   : > { %p1882_p9 = pneg %p1881_p7 }
 0x51d   : > { %p1887_p13 = pnand %p1886_p12, %p1882_p9 }
 0x51f   : > { %1890 = shalt.err (!%p1887_p13)
}
 0x520   : > { %1703 = dma.vmem_to_hbm [thread:$0]  (%p2104_p4), %s1497_s22, 128, %s1494_s17, %s1468_s27  }
 0x521   : > { %s2562_s0 = sshll.u32 %s2446_s28, 3  ;;  %s2563_s20 = sshll.u32 %s1963_s16, 7 }
 0x522   : > { %s507_s1 = scalar_lea.vmem [#allocation10], %s2562_s0  ;;  %s2479_s4 = scalar_lea.hbm %s2540_s13, %s2563_s20 }
 0x523   : > { %s1482_s2 = sshll.u32 %s507_s1, 4  ;;  %s1463_s3 = scalar_lea.sflag [#allocation11], %s2446_s28  ;;  %s2481_s2 = int_to_ptr.vmem [resolvable:$true] %s1482_s2 }
 0x524   : > { %s1891_s19 = scalar_lea.vmem %s2481_s2, 128  ;;  %s1988_s16 = smov [#allocation10]  }
 0x525   : > { %p1892_p0 = scmp.ne.s32.totalorder %s2481_s2, %s1891_s19  ;;  %s1895_s17 = sshll.u32 %s1988_s16, 4  ;;  %s1896_s17 = int_to_ptr.vmem [resolvable:$false] %s1895_s17 }
 0x526   : > { %s1897_s22 = scalar_lea.vmem %s1896_s17, 256  ;;  %p1898_p3 = scmp.lt.s32.totalorder %s2481_s2, %s1896_s17 }
 0x527   : > { %p1893_p1 = pnand %p1892_p0, %p2104_p4  ;;  %p1899_p5 = scmp.lt.s32.totalorder %s1897_s22, %s1891_s19 }
 0x529   : > { %p1894_p2 = pneg %p1893_p1  ;;  %p1900_p6 = por %p1899_p5, %p1898_p3 }
 0x52b   : > { %p1901_p7 = pnand %p1900_p6, %p1894_p2 }
 0x5d4   : > { %v1455_v2 = vpop.f32.mrf.mxu0 }
 0x5d5   : > { %1461 = vst.msk [vmem:[%s507_s1] sm:$0xff] %vm541_vm0, %v1455_v2 }
 0x5d6   : > { %v1700_v11 = vpop.f32.mrf.mxu0 }
 0x5d7   : > { %1904 = shalt.err (!%p1901_p7)
}
 0x5d8   : > { %s1905_s27 = scalar_lea.hbm %s2479_s4, 128  ;;  %s1909_s0 = scalar_lea.hbm %s2540_s13, 256 }
 0x5d9   : > { %p1906_p9 = scmp.ne.s32.totalorder %s2479_s4, %s1905_s27  ;;  %p1910_p12 = scmp.lt.s32.totalorder %s2479_s4, %s2540_s13 }
 0x5da   : > { %p1911_p13 = scmp.lt.s32.totalorder %s1909_s0, %s1905_s27 }
 0x5db   : > { %p1907_p10 = pnand %p1906_p9, %p2104_p4 }
 0x5dc   : > { %p1912_p0 = por %p1911_p13, %p1910_p12 }
 0x5dd   : > { %p1908_p11 = pneg %p1907_p10 }
 0x5df   : > { %p1913_p1 = pnand %p1912_p0, %p1908_p11 }
 0x5e1   : > { %1916 = shalt.err (!%p1913_p1)
}
 0x5e2   : > { %1702 = dma.vmem_to_hbm [thread:$0]  (%p2104_p4), %s2481_s2, 128, %s2479_s4, %s1463_s3   ;;  %v1458_v23 = vpop.f32.mrf.mxu0 }
 0x5e4   : > { %v1701_v16 = vpop.f32.mrf.mxu0 }
 0x5e5 PF: > { %s2564_s24 = sld [smem:[#allocation16_spill]]  ;;  %p1713_p2 = scmp.ge.s32.totalorder %s1971_s18, 2 }
 0x5e7   : > { %p1707_p3 = pnand %p1713_p2, %p2111_p8 }
 0x5e9   : > { %p1708_p5 = pneg %p1707_p3 }
 0x5eb   : > { %s1508_s29 = sand.u32 1, %s2564_s24  }
 0x5ec   : > { %s1509_s19 = scalar_lea.sflag [#allocation11], %s1508_s29 }
 0x5ed   : > { %1942 = dma.done.wait (%p1708_p5), %s1509_s19, 128  }
 0x5ee   : > { %1944 = vsyncadd (%p1708_p5), %s1509_s19, 4294967168  ;;  %s1518_s16 = scalar_lea.sflag [#allocation13], %s1508_s29 }
 0x5ef   : > { %1946 = dma.done.wait (%p1708_p5), %s1518_s16, 128  }
 0x5f0   : > { %1948 = vsyncadd (%p1708_p5), %s1518_s16, 4294967168  ;;  %s31_s18 = sadd.s32 1, %s1971_s18   ;;  %s2565_s16 = sld [smem:[#allocation17_spill]] }
 0x5f1   : > { %p28_p4 = scmp.ge.s32.totalorder %s31_s18, 4   ;;  %s2566_s17 = sld [smem:[#allocation18_spill]] }
 0x5f2   : > { %s2567_s29 = smov %s1955_s30  ;;  %s2568_s30 = smov %s1959_s15 }
 0x5f3   : > { %s2569_s15 = smov %s2117_s26  ;;  %30 = sbr.rel (!%p28_p4) target bundleno = 12 (0xc), region = 131 }
 0x5f8   :  { %1523 = vsyncpa [#allocation11], 1 }
 0x5f9   :  { %1525 = vsyncpa [#allocation11 + $0x1], 1 }
 0x5fa   :  { %1526 = vsyncpa [#allocation13], 1 }
 0x5fb   :  { %1528 = vsyncpa [#allocation13 + $0x1], 1 }

</bundles_post_ra>
